<compile_context>
chip_gen: v5e
topology: v5e:2x2
jax: 0.10.0
libtpu: 0.0.40
codegen_flags: <defaults>
</compile_context>

<pallas_src>
import math
from functools import partial

import jax
import jax.numpy as jnp
from jax.experimental import pallas as pl
from jax.experimental.pallas import tpu as pltpu

# ----------------------------- scaled-down BERT config -----------------------------
H = 128                 # stands in for BERT_HIDDEN_SIZE (=768 in the torch module)
N_LAYERS = 2
N_HEADS = 2
D_HEAD = H // N_HEADS
INTERMEDIATE = 256
VOCAB = 64
MAX_POS = 16
N_SENTIMENT_CLASSES = 5
OUT_PAD = 128           # lane-dense padded logits width (sliced back outside)
LN_EPS = 1e-12


# =============================== in-kernel helpers =================================
def _ln(x, g, b):
    mu = jnp.mean(x, axis=-1, keepdims=True)
    var = jnp.mean((x - mu) ** 2, axis=-1, keepdims=True)
    return (x - mu) * jax.lax.rsqrt(var + LN_EPS) * g + b


# ==================== fused encoder + pooler + LSTM/CNN head kernel ================
def _multitask_kernel(x_emb_ref, add_ref, embg_ref, embb_ref,
                      wqkv_ref, bqkv_ref, wo_ref, bo_ref, ln1g_ref, ln1b_ref,
                      w1_ref, b1_ref, w2_ref, b2_ref, ln2g_ref, ln2b_ref,
                      pw_ref, pb_ref, wih_ref, bg_ref, wc_ref, bc_ref,
                      wout_ref, bout_ref,
                      o_ref, x_sc, *, paired):
    """One grid step == one transformer layer; final step also runs the task head."""
    l = pl.program_id(0)
    n_sent, _, S = add_ref.shape            # additive padding mask [n_sent, 1, S]
    BS = x_sc.shape[0]                      # n_sent * S

    @pl.when(l == 0)
    def _():
        # embedding LayerNorm fused into the first layer step
        x_sc[...] = _ln(x_emb_ref[...], embg_ref[...], embb_ref[...])

    x = x_sc[...]                           # [BS, H] f32, VMEM resident
    xb = x.astype(jnp.bfloat16)             # hoisted: one cast reused below

    # ---- fused Q|K|V projection (single [H, 3H] matmul, bf16 in / f32 acc) --------
    qkv = jnp.dot(xb, wqkv_ref[0], preferred_element_type=jnp.float32) + bqkv_ref[0]
    q = qkv[:, 0 * H:1 * H].reshape(n_sent, S, H)
    k = qkv[:, 1 * H:2 * H].reshape(n_sent, S, H)
    v = qkv[:, 2 * H:3 * H].reshape(n_sent, S, H)

    # ---- per-sentence multi-head attention: scores are [n_sent, S, S] -------------
    scale = 1.0 / math.sqrt(D_HEAD)
    add = add_ref[...]                      # broadcast over the query dim
    ctx_heads = []
    for h in range(N_HEADS):                # static unroll (N_HEADS=2)
        sl = slice(h * D_HEAD, (h + 1) * D_HEAD)
        s = jnp.einsum('bqd,bkd->bqk', q[:, :, sl], k[:, :, sl],
                       preferred_element_type=jnp.float32) * scale + add
        s = s - jnp.max(s, axis=-1, keepdims=True)
        p = jnp.exp(s)
        p = p * pl.reciprocal(jnp.sum(p, axis=-1, keepdims=True), approx=True)
        ctx_heads.append(jnp.einsum('bqk,bkd->bqd', p, v[:, :, sl],
                                    preferred_element_type=jnp.float32))
    ctx = jnp.concatenate(ctx_heads, axis=-1).reshape(BS, H)

    attn = jnp.dot(ctx.astype(jnp.bfloat16), wo_ref[0],
                   preferred_element_type=jnp.float32) + bo_ref[0]
    x = _ln(x + attn, ln1g_ref[0], ln1b_ref[0])

    # ---- FFN ----------------------------------------------------------------------
    ffn = jnp.dot(x.astype(jnp.bfloat16), w1_ref[0],
                  preferred_element_type=jnp.float32) + b1_ref[0]
    # TODO(synk): HF BERT uses exact erf-GELU; tanh approximation for Mosaic lowering.
    ffn = jax.nn.gelu(ffn, approximate=True)
    ffn = jnp.dot(ffn.astype(jnp.bfloat16), w2_ref[0],
                  preferred_element_type=jnp.float32) + b2_ref[0]
    x = _ln(x + ffn, ln2g_ref[0], ln2b_ref[0])
    x_sc[...] = x

    # ---- final step: pooler -> LSTM cell -> Conv1d center tap -> ReLU -> Linear ----
    @pl.when(l == pl.num_programs(0) - 1)
    def _():
        cls = x.reshape(n_sent, S, H)[:, 0, :]                        # [CLS] rows
        pooled = jnp.tanh(jnp.dot(cls, pw_ref[...],
                                  preferred_element_type=jnp.float32) + pb_ref[...])
        if paired:
            npair = n_sent // 2
            # concat([p1, p2]) @ W_ih == p1 @ W_ih[:H] + p2 @ W_ih[H:]
            gates = (jnp.dot(pooled[:npair], wih_ref[pl.ds(0, H), :],
                             preferred_element_type=jnp.float32)
                     + jnp.dot(pooled[npair:], wih_ref[pl.ds(H, H), :],
                               preferred_element_type=jnp.float32)
                     + bg_ref[...])
        else:
            gates = jnp.dot(pooled, wih_ref[...],
                            preferred_element_type=jnp.float32) + bg_ref[...]
        # torch LSTM gate order i,f,g,o; h0=c0=0 => forget gate and W_hh drop out
        # for a length-1 sequence.
        i_g = jax.nn.sigmoid(gates[:, 0 * H:1 * H])
        g_g = jnp.tanh(gates[:, 2 * H:3 * H])
        o_g = jax.nn.sigmoid(gates[:, 3 * H:4 * H])
        hvec = o_g * jnp.tanh(i_g * g_g)
        # Conv1d(k=3, padding=1) on a length-1 sequence == linear with the center tap;
        # torch.max over the (size-1) length dim is the identity.
        y = jnp.maximum(jnp.dot(hvec, wc_ref[...],
                                preferred_element_type=jnp.float32) + bc_ref[...], 0.0)
        o_ref[...] = jnp.dot(y, wout_ref[...],
                             preferred_element_type=jnp.float32) + bout_ref[...]


def _const_spec(shape):
    """Whole-array block, same block for every layer step (DMA'd once)."""
    return pl.BlockSpec(shape, lambda l: (0,) * len(shape))


def _layer_spec(shape):
    """Per-layer block: leading axis indexed by the layer grid step."""
    return pl.BlockSpec((1,) + shape, lambda l: (l,) + (0,) * len(shape))


# =============================== fused forward ======================================
def _multitask_forward(bp, hp, input_ids, attention_mask, *, paired, n_out):
    n_sent, S = input_ids.shape
    BS = n_sent * S
    B_out = n_sent // 2 if paired else n_sent
    d_in = hp["w_ih"].shape[0]

    # plain-JAX glue: embedding gather + [n_sent, 1, S] additive padding row
    x = (bp["word_emb"][input_ids]
         + bp["pos_emb"][:S][None, :, :]
         + bp["type_emb"][0][None, None, :]).reshape(BS, H)          # token_type = 0
    add = ((1.0 - attention_mask.astype(jnp.float32)) * -10000.0).reshape(n_sent, 1, S)

    operands = (x, add, bp["emb_ln_g"], bp["emb_ln_b"],
                bp["w_qkv"], bp["b_qkv"], bp["w_o"], bp["b_o"],
                bp["ln1_g"], bp["ln1_b"], bp["w1"], bp["b1"],
                bp["w2"], bp["b2"], bp["ln2_g"], bp["ln2_b"],
                bp["pooler_w"], bp["pooler_b"],
                hp["w_ih"], hp["b_gates"], hp["w_conv_c"], hp["b_conv"],
                hp["w_out"], hp["b_out"])

    in_specs = [
        _const_spec((BS, H)),                 # token embeddings
        _const_spec((n_sent, 1, S)),          # additive padding mask
        _const_spec((1, H)),                  # embedding LN gamma
        _const_spec((1, H)),                  # embedding LN beta
        _layer_spec((H, 3 * H)),              # w_qkv  (bf16)
        _layer_spec((1, 3 * H)),              # b_qkv
        _layer_spec((H, H)),                  # w_o    (bf16)
        _layer_spec((1, H)),                  # b_o
        _layer_spec((1, H)),                  # ln1_g
        _layer_spec((1, H)),                  # ln1_b
        _layer_spec((H, INTERMEDIATE)),       # w1     (bf16)
        _layer_spec((1, INTERMEDIATE)),       # b1
        _layer_spec((INTERMEDIATE, H)),       # w2     (bf16)
        _layer_spec((1, H)),                  # b2
        _layer_spec((1, H)),                  # ln2_g
        _layer_spec((1, H)),                  # ln2_b
        _const_spec((H, H)),                  # pooler_w
        _const_spec((1, H)),                  # pooler_b
        _const_spec((d_in, 4 * H)),           # LSTM weight_ih.T
        _const_spec((1, 4 * H)),              # LSTM gate biases
        _const_spec((H, H)),                  # conv center tap
        _const_spec((1, H)),                  # conv bias
        _const_spec((H, OUT_PAD)),            # classifier weight (lane-padded)
        _const_spec((1, OUT_PAD)),            # classifier bias   (lane-padded)
    ]

    flops = (N_LAYERS * (2 * BS * H * (3 * H + H + 2 * INTERMEDIATE)
                         + 4 * n_sent * S * S * H)
             + 2 * n_sent * H * H
             + 2 * B_out * (d_in * 4 * H + H * H + H * OUT_PAD))
    transcendentals = (N_LAYERS * (N_HEADS * n_sent * S * S + BS * INTERMEDIATE)
                       + 6 * B_out * H)
    bytes_accessed = (sum(int(a.size) * a.dtype.itemsize for a in operands)
                      + B_out * OUT_PAD * 4)

    logits = pl.pallas_call(
        partial(_multitask_kernel, paired=paired),
        grid=(N_LAYERS,),
        in_specs=in_specs,
        out_specs=pl.BlockSpec((B_out, OUT_PAD), lambda l: (0, 0)),
        out_shape=jax.ShapeDtypeStruct((B_out, OUT_PAD), jnp.float32),
        scratch_shapes=[pltpu.VMEM((BS, H), jnp.float32)],
        compiler_params=pltpu.CompilerParams(
            dimension_semantics=("arbitrary",),        # layer axis carries state
            vmem_limit_bytes=32 * 1024 * 1024),
        cost_estimate=pl.CostEstimate(flops=flops,
                                      transcendentals=transcendentals,
                                      bytes_accessed=bytes_accessed),
    )(*operands)
    return logits[:, :n_out]


# =============================== task heads ========================================
def predict_sentiment(params, input_ids, attention_mask):
    return _multitask_forward(params["bert"], params["sentiment"],
                              input_ids, attention_mask,
                              paired=False, n_out=N_SENTIMENT_CLASSES)


def _predict_pair(params, head_key, ids1, mask1, ids2, mask2):
    # batch both sentences of every pair into ONE encoder pass; attention is
    # per-sentence inside the kernel so they stay independent.
    ids = jnp.concatenate([ids1, ids2], axis=0)
    mask = jnp.concatenate([mask1, mask2], axis=0)
    return _multitask_forward(params["bert"], params[head_key], ids, mask,
                              paired=True, n_out=1)


def predict_paraphrase(params, ids1, mask1, ids2, mask2):
    return _predict_pair(params, "paraphrase", ids1, mask1, ids2, mask2)


def predict_similarity(params, ids1, mask1, ids2, mask2):
    return _predict_pair(params, "similarity", ids1, mask1, ids2, mask2)


# =============================== deterministic parameter init ======================
class _KeyGen:
    def __init__(self, key):
        self._key = key

    def __call__(self):
        self._key, sub = jax.random.split(self._key)
        return sub


def _init_head(nk, d_in, n_out):
    def nrm(shape):
        return 0.02 * jax.random.normal(nk(), shape, dtype=jnp.float32)
    # torch shapes: LSTM weight_ih [4H, d_in] (W_hh unused for h0=0),
    # Conv1d weight [H, H, 3] (only the center tap matters for L=1), Linear [n_out, H].
    # Classifier weights zero-padded to a 128-wide lane-dense last dim.
    w_out = jnp.zeros((H, OUT_PAD), jnp.float32).at[:, :n_out].set(nrm((H, n_out)))
    b_out = jnp.zeros((1, OUT_PAD), jnp.float32).at[:, :n_out].set(nrm((1, n_out)))
    return {
        "w_ih": nrm((d_in, 4 * H)),                # weight_ih_l0.T
        "b_gates": nrm((1, 4 * H)),                # bias_ih + bias_hh (combined)
        "w_conv_c": nrm((H, H)),                   # conv weight[:, :, 1].T
        "b_conv": nrm((1, H)),
        "w_out": w_out,
        "b_out": b_out,
    }


def init_params(key):
    nk = _KeyGen(key)

    def nrm(shape, dtype=jnp.float32):
        return (0.02 * jax.random.normal(nk(), shape, dtype=jnp.float32)).astype(dtype)

    L = N_LAYERS
    bert = {
        "word_emb": nrm((VOCAB, H)),
        "pos_emb": nrm((MAX_POS, H)),
        "type_emb": nrm((2, H)),
        "emb_ln_g": jnp.ones((1, H), jnp.float32),
        "emb_ln_b": jnp.zeros((1, H), jnp.float32),
        # per-layer encoder weights stacked on a leading layer axis so the layer loop
        # becomes the Pallas grid axis; matmul weights stored bf16 (f32 accumulation).
        "w_qkv": nrm((L, H, 3 * H), jnp.bfloat16),      # wq | wk | wv fused
        "b_qkv": jnp.zeros((L, 1, 3 * H), jnp.float32),
        "w_o": nrm((L, H, H), jnp.bfloat16),
        "b_o": jnp.zeros((L, 1, H), jnp.float32),
        "ln1_g": jnp.ones((L, 1, H), jnp.float32),
        "ln1_b": jnp.zeros((L, 1, H), jnp.float32),
        "w1": nrm((L, H, INTERMEDIATE), jnp.bfloat16),
        "b1": jnp.zeros((L, 1, INTERMEDIATE), jnp.float32),
        "w2": nrm((L, INTERMEDIATE, H), jnp.bfloat16),
        "b2": jnp.zeros((L, 1, H), jnp.float32),
        "ln2_g": jnp.ones((L, 1, H), jnp.float32),
        "ln2_b": jnp.zeros((L, 1, H), jnp.float32),
        "pooler_w": nrm((H, H)),
        "pooler_b": jnp.zeros((1, H), jnp.float32),
    }
    return {
        "bert": bert,
        "sentiment": _init_head(nk, H, N_SENTIMENT_CLASSES),
        "paraphrase": _init_head(nk, 2 * H, 1),
        "similarity": _init_head(nk, 2 * H, 1),
    }


# =============================== demo ==============================================
if __name__ == "__main__":
    B, S = 2, 8
    root = jax.random.PRNGKey(0)
    k_params, k_ids1, k_ids2 = jax.random.split(root, 3)

    params = init_params(k_params)
    ids1 = jax.random.randint(k_ids1, (B, S), 0, VOCAB, dtype=jnp.int32)
    ids2 = jax.random.randint(k_ids2, (B, S), 0, VOCAB, dtype=jnp.int32)
    mask1 = jnp.ones((B, S), jnp.int32).at[1, S - 2:].set(0)   # pad tail of sentence 1
    mask2 = jnp.ones((B, S), jnp.int32).at[0, S - 1:].set(0)   # pad tail of sentence 0

    sent = jax.jit(predict_sentiment)(params, ids1, mask1)
    para = jax.jit(predict_paraphrase)(params, ids1, mask1, ids2, mask2)
    sim = jax.jit(predict_similarity)(params, ids1, mask1, ids2, mask2)
    jax.block_until_ready((sent, para, sim))

    assert sent.shape == (B, N_SENTIMENT_CLASSES)
    assert para.shape == (B, 1)
    assert sim.shape == (B, 1)
    assert all(bool(jnp.all(jnp.isfinite(t))) for t in (sent, para, sim))
    print("KERNEL_OK")
</pallas_src>

<mosaic_0001>
module attributes {stable_mosaic.version = 11 : i64} {
  func.func @_multitask_kernel(%arg0: i32, %arg1: memref<16x128xf32, #tpu.memory_space<vmem>>, %arg2: memref<2x1x8xf32, #tpu.memory_space<vmem>>, %arg3: memref<1x128xf32, #tpu.memory_space<vmem>>, %arg4: memref<1x128xf32, #tpu.memory_space<vmem>>, %arg5: memref<1x128x384xbf16, #tpu.memory_space<vmem>>, %arg6: memref<1x1x384xf32, #tpu.memory_space<vmem>>, %arg7: memref<1x128x128xbf16, #tpu.memory_space<vmem>>, %arg8: memref<1x1x128xf32, #tpu.memory_space<vmem>>, %arg9: memref<1x1x128xf32, #tpu.memory_space<vmem>>, %arg10: memref<1x1x128xf32, #tpu.memory_space<vmem>>, %arg11: memref<1x128x256xbf16, #tpu.memory_space<vmem>>, %arg12: memref<1x1x256xf32, #tpu.memory_space<vmem>>, %arg13: memref<1x256x128xbf16, #tpu.memory_space<vmem>>, %arg14: memref<1x1x128xf32, #tpu.memory_space<vmem>>, %arg15: memref<1x1x128xf32, #tpu.memory_space<vmem>>, %arg16: memref<1x1x128xf32, #tpu.memory_space<vmem>>, %arg17: memref<128x128xf32, #tpu.memory_space<vmem>>, %arg18: memref<1x128xf32, #tpu.memory_space<vmem>>, %arg19: memref<128x512xf32, #tpu.memory_space<vmem>>, %arg20: memref<1x512xf32, #tpu.memory_space<vmem>>, %arg21: memref<128x128xf32, #tpu.memory_space<vmem>>, %arg22: memref<1x128xf32, #tpu.memory_space<vmem>>, %arg23: memref<128x128xf32, #tpu.memory_space<vmem>>, %arg24: memref<1x128xf32, #tpu.memory_space<vmem>>, %arg25: memref<2x128xf32, #tpu.memory_space<vmem>>, %arg26: memref<16x128xf32, #tpu.memory_space<vmem>>) attributes {dimension_semantics = [#tpu.dimension_semantics<arbitrary>], iteration_bounds = array<i64: 2>, scalar_prefetch = 0 : i64, scratch_operands = 1 : i64, tpu.core_type = #tpu.core_type<tc>, window_params = [{pipeline_mode = #tpu.pipeline_mode<synchronous>, transform_indices = @transform_0, window_bounds = array<i64: 16, 128>}, {pipeline_mode = #tpu.pipeline_mode<synchronous>, transform_indices = @transform_1, window_bounds = array<i64: 2, 1, 8>}, {pipeline_mode = #tpu.pipeline_mode<synchronous>, transform_indices = @transform_2, window_bounds = array<i64: 1, 128>}, {pipeline_mode = #tpu.pipeline_mode<synchronous>, transform_indices = @transform_3, window_bounds = array<i64: 1, 128>}, {transform_indices = @transform_4, window_bounds = array<i64: 1, 128, 384>}, {transform_indices = @transform_5, window_bounds = array<i64: 1, 1, 384>}, {transform_indices = @transform_6, window_bounds = array<i64: 1, 128, 128>}, {transform_indices = @transform_7, window_bounds = array<i64: 1, 1, 128>}, {transform_indices = @transform_8, window_bounds = array<i64: 1, 1, 128>}, {transform_indices = @transform_9, window_bounds = array<i64: 1, 1, 128>}, {transform_indices = @transform_10, window_bounds = array<i64: 1, 128, 256>}, {transform_indices = @transform_11, window_bounds = array<i64: 1, 1, 256>}, {transform_indices = @transform_12, window_bounds = array<i64: 1, 256, 128>}, {transform_indices = @transform_13, window_bounds = array<i64: 1, 1, 128>}, {transform_indices = @transform_14, window_bounds = array<i64: 1, 1, 128>}, {transform_indices = @transform_15, window_bounds = array<i64: 1, 1, 128>}, {pipeline_mode = #tpu.pipeline_mode<synchronous>, transform_indices = @transform_16, window_bounds = array<i64: 128, 128>}, {pipeline_mode = #tpu.pipeline_mode<synchronous>, transform_indices = @transform_17, window_bounds = array<i64: 1, 128>}, {pipeline_mode = #tpu.pipeline_mode<synchronous>, transform_indices = @transform_18, window_bounds = array<i64: 128, 512>}, {pipeline_mode = #tpu.pipeline_mode<synchronous>, transform_indices = @transform_19, window_bounds = array<i64: 1, 512>}, {pipeline_mode = #tpu.pipeline_mode<synchronous>, transform_indices = @transform_20, window_bounds = array<i64: 128, 128>}, {pipeline_mode = #tpu.pipeline_mode<synchronous>, transform_indices = @transform_21, window_bounds = array<i64: 1, 128>}, {pipeline_mode = #tpu.pipeline_mode<synchronous>, transform_indices = @transform_22, window_bounds = array<i64: 128, 128>}, {pipeline_mode = #tpu.pipeline_mode<synchronous>, transform_indices = @transform_23, window_bounds = array<i64: 1, 128>}, {pipeline_mode = #tpu.pipeline_mode<synchronous>, transform_indices = @transform_24, window_bounds = array<i64: 2, 128>}]} {
    %c0_i32 = arith.constant 0 : i32
    %0 = arith.cmpi eq, %arg0, %c0_i32 : i32
    %1 = arith.extui %0 : i1 to i32
    %c0_i32_0 = arith.constant 0 : i32
    %2 = arith.cmpi ne, %1, %c0_i32_0 : i32
    scf.if %2 {
      %c0_71 = arith.constant 0 : index
      %c0_72 = arith.constant 0 : index
      %154 = vector.load %arg1[%c0_71, %c0_72] : memref<16x128xf32, #tpu.memory_space<vmem>>, vector<16x128xf32>
      %c0_73 = arith.constant 0 : index
      %c0_74 = arith.constant 0 : index
      %155 = vector.load %arg3[%c0_73, %c0_74] : memref<1x128xf32, #tpu.memory_space<vmem>>, vector<1x128xf32>
      %c0_75 = arith.constant 0 : index
      %c0_76 = arith.constant 0 : index
      %156 = vector.load %arg4[%c0_75, %c0_76] : memref<1x128xf32, #tpu.memory_space<vmem>>, vector<1x128xf32>
      %cst_77 = arith.constant dense<0.000000e+00> : vector<16xf32>
      %157 = vector.multi_reduction <add>, %154, %cst_77 [1] : vector<16x128xf32> to vector<16xf32>
      %158 = vector.shape_cast %157 : vector<16xf32> to vector<16x1xf32>
      %cst_78 = arith.constant 1.280000e+02 : f32
      %159 = vector.broadcast %cst_78 : f32 to vector<16x1xf32>
      %160 = arith.divf %158, %159 : vector<16x1xf32>
      %161 = vector.broadcast %160 : vector<16x1xf32> to vector<16x128xf32>
      %162 = arith.subf %154, %161 : vector<16x128xf32>
      %163 = arith.mulf %162, %162 : vector<16x128xf32>
      %cst_79 = arith.constant dense<0.000000e+00> : vector<16xf32>
      %164 = vector.multi_reduction <add>, %163, %cst_79 [1] : vector<16x128xf32> to vector<16xf32>
      %165 = vector.shape_cast %164 : vector<16xf32> to vector<16x1xf32>
      %cst_80 = arith.constant 1.280000e+02 : f32
      %166 = vector.broadcast %cst_80 : f32 to vector<16x1xf32>
      %167 = arith.divf %165, %166 : vector<16x1xf32>
      %168 = vector.broadcast %160 : vector<16x1xf32> to vector<16x128xf32>
      %169 = arith.subf %154, %168 : vector<16x128xf32>
      %cst_81 = arith.constant 9.99999996E-13 : f32
      %170 = vector.broadcast %cst_81 : f32 to vector<16x1xf32>
      %171 = arith.addf %167, %170 : vector<16x1xf32>
      %172 = math.rsqrt %171 : vector<16x1xf32>
      %173 = vector.broadcast %172 : vector<16x1xf32> to vector<16x128xf32>
      %174 = arith.mulf %169, %173 : vector<16x128xf32>
      %175 = vector.broadcast %155 : vector<1x128xf32> to vector<16x128xf32>
      %176 = arith.mulf %174, %175 : vector<16x128xf32>
      %177 = vector.broadcast %156 : vector<1x128xf32> to vector<16x128xf32>
      %178 = arith.addf %176, %177 : vector<16x128xf32>
      %c0_82 = arith.constant 0 : index
      %c0_83 = arith.constant 0 : index
      %179 = vector.load %arg26[%c0_82, %c0_83] : memref<16x128xf32, #tpu.memory_space<vmem>>, vector<16x128xf32>
      tpu.vector_store %arg26[%c0_82, %c0_83], %178 {strides = array<i32>} : memref<16x128xf32, #tpu.memory_space<vmem>>, vector<16x128xf32>,
    } else {
    }
    %c0 = arith.constant 0 : index
    %c0_1 = arith.constant 0 : index
    %3 = vector.load %arg26[%c0, %c0_1] : memref<16x128xf32, #tpu.memory_space<vmem>>, vector<16x128xf32>
    %4 = arith.truncf %3 : vector<16x128xf32> to vector<16x128xbf16>
    %c0_2 = arith.constant 0 : index
    %c0_3 = arith.constant 0 : index
    %c0_4 = arith.constant 0 : index
    %5 = vector.load %arg5[%c0_2, %c0_3, %c0_4] : memref<1x128x384xbf16, #tpu.memory_space<vmem>>, vector<1x128x384xbf16>
    %6 = vector.shape_cast %5 : vector<1x128x384xbf16> to vector<128x384xbf16>
    %cst = arith.constant dense<0.000000e+00> : vector<16x384xf32>
    %7 = tpu.matmul %4, %6, %cst {dimension_numbers = #tpu.dot_dimension_numbers<[1], [0], [0], [1], [0, 0, 1, 1], [], []>} : vector<16x128xbf16>, vector<128x384xbf16>, vector<16x384xf32> -> vector<16x384xf32>
    %c0_5 = arith.constant 0 : index
    %c0_6 = arith.constant 0 : index
    %c0_7 = arith.constant 0 : index
    %8 = vector.load %arg6[%c0_5, %c0_6, %c0_7] : memref<1x1x384xf32, #tpu.memory_space<vmem>>, vector<1x1x384xf32>
    %9 = vector.shape_cast %8 : vector<1x1x384xf32> to vector<1x384xf32>
    %10 = vector.broadcast %9 : vector<1x384xf32> to vector<16x384xf32>
    %11 = arith.addf %7, %10 : vector<16x384xf32>
    %12 = vector.extract_strided_slice %11 {offsets = [0, 0], sizes = [16, 128], strides = [1, 1]} : vector<16x384xf32> to vector<16x128xf32>
    %13 = vector.shape_cast %12 : vector<16x128xf32> to vector<2x8x128xf32>
    %14 = vector.extract_strided_slice %11 {offsets = [0, 128], sizes = [16, 128], strides = [1, 1]} : vector<16x384xf32> to vector<16x128xf32>
    %15 = vector.shape_cast %14 : vector<16x128xf32> to vector<2x8x128xf32>
    %16 = vector.extract_strided_slice %11 {offsets = [0, 256], sizes = [16, 128], strides = [1, 1]} : vector<16x384xf32> to vector<16x128xf32>
    %17 = vector.shape_cast %16 : vector<16x128xf32> to vector<2x8x128xf32>
    %c0_8 = arith.constant 0 : index
    %c0_9 = arith.constant 0 : index
    %c0_10 = arith.constant 0 : index
    %18 = vector.load %arg2[%c0_8, %c0_9, %c0_10] : memref<2x1x8xf32, #tpu.memory_space<vmem>>, vector<2x1x8xf32>
    %19 = vector.extract_strided_slice %13 {offsets = [0, 0, 0], sizes = [2, 8, 64], strides = [1, 1, 1]} : vector<2x8x128xf32> to vector<2x8x64xf32>
    %20 = vector.extract_strided_slice %15 {offsets = [0, 0, 0], sizes = [2, 8, 64], strides = [1, 1, 1]} : vector<2x8x128xf32> to vector<2x8x64xf32>
    "tpu.trace_start"() <{level = 10 : i32, message = "bqd,bkd->bqk"}> : () -> ()
    %cst_11 = arith.constant dense<0.000000e+00> : vector<2x8x8xf32>
    %21 = tpu.matmul %19, %20, %cst_11 {dimension_numbers = #tpu.dot_dimension_numbers<[2], [2], [1], [1], [0, 0, 0, 1, 1, 1], [0], [0]>} : vector<2x8x64xf32>, vector<2x8x64xf32>, vector<2x8x8xf32> -> vector<2x8x8xf32>
    "tpu.trace_stop"() : () -> ()
    %cst_12 = arith.constant 1.250000e-01 : f32
    %22 = vector.broadcast %cst_12 : f32 to vector<2x8x8xf32>
    %23 = arith.mulf %21, %22 : vector<2x8x8xf32>
    %24 = vector.broadcast %18 : vector<2x1x8xf32> to vector<2x8x8xf32>
    %25 = arith.addf %23, %24 : vector<2x8x8xf32>
    %cst_13 = arith.constant dense<0xFF800000> : vector<2x8xf32>
    %26 = vector.multi_reduction <maximumf>, %25, %cst_13 [2] : vector<2x8x8xf32> to vector<2x8xf32>
    %27 = vector.shape_cast %26 : vector<2x8xf32> to vector<2x8x1xf32>
    %28 = vector.broadcast %27 : vector<2x8x1xf32> to vector<2x8x8xf32>
    %29 = arith.subf %25, %28 : vector<2x8x8xf32>
    %30 = math.exp %29 : vector<2x8x8xf32>
    %cst_14 = arith.constant dense<0.000000e+00> : vector<2x8xf32>
    %31 = vector.multi_reduction <add>, %30, %cst_14 [2] : vector<2x8x8xf32> to vector<2x8xf32>
    %32 = vector.shape_cast %31 : vector<2x8xf32> to vector<2x8x1xf32>
    %33 = tpu.reciprocal %32 {approx = true} : vector<2x8x1xf32> -> vector<2x8x1xf32>
    %34 = vector.broadcast %33 : vector<2x8x1xf32> to vector<2x8x8xf32>
    %35 = arith.mulf %30, %34 : vector<2x8x8xf32>
    %36 = vector.extract_strided_slice %17 {offsets = [0, 0, 0], sizes = [2, 8, 64], strides = [1, 1, 1]} : vector<2x8x128xf32> to vector<2x8x64xf32>
    "tpu.trace_start"() <{level = 10 : i32, message = "bqk,bkd->bqd"}> : () -> ()
    %cst_15 = arith.constant dense<0.000000e+00> : vector<2x8x64xf32>
    %37 = tpu.matmul %35, %36, %cst_15 {dimension_numbers = #tpu.dot_dimension_numbers<[2], [1], [1], [2], [0, 0, 0, 1, 1, 2], [0], [0]>} : vector<2x8x8xf32>, vector<2x8x64xf32>, vector<2x8x64xf32> -> vector<2x8x64xf32>
    "tpu.trace_stop"() : () -> ()
    %38 = vector.extract_strided_slice %13 {offsets = [0, 0, 64], sizes = [2, 8, 64], strides = [1, 1, 1]} : vector<2x8x128xf32> to vector<2x8x64xf32>
    %39 = vector.extract_strided_slice %15 {offsets = [0, 0, 64], sizes = [2, 8, 64], strides = [1, 1, 1]} : vector<2x8x128xf32> to vector<2x8x64xf32>
    "tpu.trace_start"() <{level = 10 : i32, message = "bqd,bkd->bqk"}> : () -> ()
    %cst_16 = arith.constant dense<0.000000e+00> : vector<2x8x8xf32>
    %40 = tpu.matmul %38, %39, %cst_16 {dimension_numbers = #tpu.dot_dimension_numbers<[2], [2], [1], [1], [0, 0, 0, 1, 1, 1], [0], [0]>} : vector<2x8x64xf32>, vector<2x8x64xf32>, vector<2x8x8xf32> -> vector<2x8x8xf32>
    "tpu.trace_stop"() : () -> ()
    %cst_17 = arith.constant 1.250000e-01 : f32
    %41 = vector.broadcast %cst_17 : f32 to vector<2x8x8xf32>
    %42 = arith.mulf %40, %41 : vector<2x8x8xf32>
    %43 = vector.broadcast %18 : vector<2x1x8xf32> to vector<2x8x8xf32>
    %44 = arith.addf %42, %43 : vector<2x8x8xf32>
    %cst_18 = arith.constant dense<0xFF800000> : vector<2x8xf32>
    %45 = vector.multi_reduction <maximumf>, %44, %cst_18 [2] : vector<2x8x8xf32> to vector<2x8xf32>
    %46 = vector.shape_cast %45 : vector<2x8xf32> to vector<2x8x1xf32>
    %47 = vector.broadcast %46 : vector<2x8x1xf32> to vector<2x8x8xf32>
    %48 = arith.subf %44, %47 : vector<2x8x8xf32>
    %49 = math.exp %48 : vector<2x8x8xf32>
    %cst_19 = arith.constant dense<0.000000e+00> : vector<2x8xf32>
    %50 = vector.multi_reduction <add>, %49, %cst_19 [2] : vector<2x8x8xf32> to vector<2x8xf32>
    %51 = vector.shape_cast %50 : vector<2x8xf32> to vector<2x8x1xf32>
    %52 = tpu.reciprocal %51 {approx = true} : vector<2x8x1xf32> -> vector<2x8x1xf32>
    %53 = vector.broadcast %52 : vector<2x8x1xf32> to vector<2x8x8xf32>
    %54 = arith.mulf %49, %53 : vector<2x8x8xf32>
    %55 = vector.extract_strided_slice %17 {offsets = [0, 0, 64], sizes = [2, 8, 64], strides = [1, 1, 1]} : vector<2x8x128xf32> to vector<2x8x64xf32>
    "tpu.trace_start"() <{level = 10 : i32, message = "bqk,bkd->bqd"}> : () -> ()
    %cst_20 = arith.constant dense<0.000000e+00> : vector<2x8x64xf32>
    %56 = tpu.matmul %54, %55, %cst_20 {dimension_numbers = #tpu.dot_dimension_numbers<[2], [1], [1], [2], [0, 0, 0, 1, 1, 2], [0], [0]>} : vector<2x8x8xf32>, vector<2x8x64xf32>, vector<2x8x64xf32> -> vector<2x8x64xf32>
    "tpu.trace_stop"() : () -> ()
    %57 = tpu.concatenate %37, %56 in 2 : vector<2x8x64xf32>, vector<2x8x64xf32> -> vector<2x8x128xf32>
    %58 = vector.shape_cast %57 : vector<2x8x128xf32> to vector<16x128xf32>
    %59 = arith.truncf %58 : vector<16x128xf32> to vector<16x128xbf16>
    %c0_21 = arith.constant 0 : index
    %c0_22 = arith.constant 0 : index
    %c0_23 = arith.constant 0 : index
    %60 = vector.load %arg7[%c0_21, %c0_22, %c0_23] : memref<1x128x128xbf16, #tpu.memory_space<vmem>>, vector<1x128x128xbf16>
    %61 = vector.shape_cast %60 : vector<1x128x128xbf16> to vector<128x128xbf16>
    %cst_24 = arith.constant dense<0.000000e+00> : vector<16x128xf32>
    %62 = tpu.matmul %59, %61, %cst_24 {dimension_numbers = #tpu.dot_dimension_numbers<[1], [0], [0], [1], [0, 0, 1, 1], [], []>} : vector<16x128xbf16>, vector<128x128xbf16>, vector<16x128xf32> -> vector<16x128xf32>
    %c0_25 = arith.constant 0 : index
    %c0_26 = arith.constant 0 : index
    %c0_27 = arith.constant 0 : index
    %63 = vector.load %arg8[%c0_25, %c0_26, %c0_27] : memref<1x1x128xf32, #tpu.memory_space<vmem>>, vector<1x1x128xf32>
    %64 = vector.shape_cast %63 : vector<1x1x128xf32> to vector<1x128xf32>
    %65 = vector.broadcast %64 : vector<1x128xf32> to vector<16x128xf32>
    %66 = arith.addf %62, %65 : vector<16x128xf32>
    %67 = arith.addf %3, %66 : vector<16x128xf32>
    %c0_28 = arith.constant 0 : index
    %c0_29 = arith.constant 0 : index
    %c0_30 = arith.constant 0 : index
    %68 = vector.load %arg9[%c0_28, %c0_29, %c0_30] : memref<1x1x128xf32, #tpu.memory_space<vmem>>, vector<1x1x128xf32>
    %69 = vector.shape_cast %68 : vector<1x1x128xf32> to vector<1x128xf32>
    %c0_31 = arith.constant 0 : index
    %c0_32 = arith.constant 0 : index
    %c0_33 = arith.constant 0 : index
    %70 = vector.load %arg10[%c0_31, %c0_32, %c0_33] : memref<1x1x128xf32, #tpu.memory_space<vmem>>, vector<1x1x128xf32>
    %71 = vector.shape_cast %70 : vector<1x1x128xf32> to vector<1x128xf32>
    %cst_34 = arith.constant dense<0.000000e+00> : vector<16xf32>
    %72 = vector.multi_reduction <add>, %67, %cst_34 [1] : vector<16x128xf32> to vector<16xf32>
    %73 = vector.shape_cast %72 : vector<16xf32> to vector<16x1xf32>
    %cst_35 = arith.constant 1.280000e+02 : f32
    %74 = vector.broadcast %cst_35 : f32 to vector<16x1xf32>
    %75 = arith.divf %73, %74 : vector<16x1xf32>
    %76 = vector.broadcast %75 : vector<16x1xf32> to vector<16x128xf32>
    %77 = arith.subf %67, %76 : vector<16x128xf32>
    %78 = arith.mulf %77, %77 : vector<16x128xf32>
    %cst_36 = arith.constant dense<0.000000e+00> : vector<16xf32>
    %79 = vector.multi_reduction <add>, %78, %cst_36 [1] : vector<16x128xf32> to vector<16xf32>
    %80 = vector.shape_cast %79 : vector<16xf32> to vector<16x1xf32>
    %cst_37 = arith.constant 1.280000e+02 : f32
    %81 = vector.broadcast %cst_37 : f32 to vector<16x1xf32>
    %82 = arith.divf %80, %81 : vector<16x1xf32>
    %83 = vector.broadcast %75 : vector<16x1xf32> to vector<16x128xf32>
    %84 = arith.subf %67, %83 : vector<16x128xf32>
    %cst_38 = arith.constant 9.99999996E-13 : f32
    %85 = vector.broadcast %cst_38 : f32 to vector<16x1xf32>
    %86 = arith.addf %82, %85 : vector<16x1xf32>
    %87 = math.rsqrt %86 : vector<16x1xf32>
    %88 = vector.broadcast %87 : vector<16x1xf32> to vector<16x128xf32>
    %89 = arith.mulf %84, %88 : vector<16x128xf32>
    %90 = vector.broadcast %69 : vector<1x128xf32> to vector<16x128xf32>
    %91 = arith.mulf %89, %90 : vector<16x128xf32>
    %92 = vector.broadcast %71 : vector<1x128xf32> to vector<16x128xf32>
    %93 = arith.addf %91, %92 : vector<16x128xf32>
    %94 = arith.truncf %93 : vector<16x128xf32> to vector<16x128xbf16>
    %c0_39 = arith.constant 0 : index
    %c0_40 = arith.constant 0 : index
    %c0_41 = arith.constant 0 : index
    %95 = vector.load %arg11[%c0_39, %c0_40, %c0_41] : memref<1x128x256xbf16, #tpu.memory_space<vmem>>, vector<1x128x256xbf16>
    %96 = vector.shape_cast %95 : vector<1x128x256xbf16> to vector<128x256xbf16>
    %cst_42 = arith.constant dense<0.000000e+00> : vector<16x256xf32>
    %97 = tpu.matmul %94, %96, %cst_42 {dimension_numbers = #tpu.dot_dimension_numbers<[1], [0], [0], [1], [0, 0, 1, 1], [], []>} : vector<16x128xbf16>, vector<128x256xbf16>, vector<16x256xf32> -> vector<16x256xf32>
    %c0_43 = arith.constant 0 : index
    %c0_44 = arith.constant 0 : index
    %c0_45 = arith.constant 0 : index
    %98 = vector.load %arg12[%c0_43, %c0_44, %c0_45] : memref<1x1x256xf32, #tpu.memory_space<vmem>>, vector<1x1x256xf32>
    %99 = vector.shape_cast %98 : vector<1x1x256xf32> to vector<1x256xf32>
    %100 = vector.broadcast %99 : vector<1x256xf32> to vector<16x256xf32>
    %101 = arith.addf %97, %100 : vector<16x256xf32>
    %102 = arith.mulf %101, %101 : vector<16x256xf32>
    %103 = arith.mulf %101, %102 : vector<16x256xf32>
    %cst_46 = arith.constant 4.471500e-02 : f32
    %104 = vector.broadcast %cst_46 : f32 to vector<16x256xf32>
    %105 = arith.mulf %104, %103 : vector<16x256xf32>
    %106 = arith.addf %101, %105 : vector<16x256xf32>
    %cst_47 = arith.constant 0.797884583 : f32
    %107 = vector.broadcast %cst_47 : f32 to vector<16x256xf32>
    %108 = arith.mulf %107, %106 : vector<16x256xf32>
    %109 = math.tanh %108 : vector<16x256xf32>
    %cst_48 = arith.constant 1.000000e+00 : f32
    %110 = vector.broadcast %cst_48 : f32 to vector<16x256xf32>
    %111 = arith.addf %110, %109 : vector<16x256xf32>
    %cst_49 = arith.constant 5.000000e-01 : f32
    %112 = vector.broadcast %cst_49 : f32 to vector<16x256xf32>
    %113 = arith.mulf %112, %111 : vector<16x256xf32>
    %114 = arith.mulf %101, %113 : vector<16x256xf32>
    %115 = arith.truncf %114 : vector<16x256xf32> to vector<16x256xbf16>
    %c0_50 = arith.constant 0 : index
    %c0_51 = arith.constant 0 : index
    %c0_52 = arith.constant 0 : index
    %116 = vector.load %arg13[%c0_50, %c0_51, %c0_52] : memref<1x256x128xbf16, #tpu.memory_space<vmem>>, vector<1x256x128xbf16>
    %117 = vector.shape_cast %116 : vector<1x256x128xbf16> to vector<256x128xbf16>
    %cst_53 = arith.constant dense<0.000000e+00> : vector<16x128xf32>
    %118 = tpu.matmul %115, %117, %cst_53 {dimension_numbers = #tpu.dot_dimension_numbers<[1], [0], [0], [1], [0, 0, 1, 1], [], []>} : vector<16x256xbf16>, vector<256x128xbf16>, vector<16x128xf32> -> vector<16x128xf32>
    %c0_54 = arith.constant 0 : index
    %c0_55 = arith.constant 0 : index
    %c0_56 = arith.constant 0 : index
    %119 = vector.load %arg14[%c0_54, %c0_55, %c0_56] : memref<1x1x128xf32, #tpu.memory_space<vmem>>, vector<1x1x128xf32>
    %120 = vector.shape_cast %119 : vector<1x1x128xf32> to vector<1x128xf32>
    %121 = vector.broadcast %120 : vector<1x128xf32> to vector<16x128xf32>
    %122 = arith.addf %118, %121 : vector<16x128xf32>
    %123 = arith.addf %93, %122 : vector<16x128xf32>
    %c0_57 = arith.constant 0 : index
    %c0_58 = arith.constant 0 : index
    %c0_59 = arith.constant 0 : index
    %124 = vector.load %arg15[%c0_57, %c0_58, %c0_59] : memref<1x1x128xf32, #tpu.memory_space<vmem>>, vector<1x1x128xf32>
    %125 = vector.shape_cast %124 : vector<1x1x128xf32> to vector<1x128xf32>
    %c0_60 = arith.constant 0 : index
    %c0_61 = arith.constant 0 : index
    %c0_62 = arith.constant 0 : index
    %126 = vector.load %arg16[%c0_60, %c0_61, %c0_62] : memref<1x1x128xf32, #tpu.memory_space<vmem>>, vector<1x1x128xf32>
    %127 = vector.shape_cast %126 : vector<1x1x128xf32> to vector<1x128xf32>
    %cst_63 = arith.constant dense<0.000000e+00> : vector<16xf32>
    %128 = vector.multi_reduction <add>, %123, %cst_63 [1] : vector<16x128xf32> to vector<16xf32>
    %129 = vector.shape_cast %128 : vector<16xf32> to vector<16x1xf32>
    %cst_64 = arith.constant 1.280000e+02 : f32
    %130 = vector.broadcast %cst_64 : f32 to vector<16x1xf32>
    %131 = arith.divf %129, %130 : vector<16x1xf32>
    %132 = vector.broadcast %131 : vector<16x1xf32> to vector<16x128xf32>
    %133 = arith.subf %123, %132 : vector<16x128xf32>
    %134 = arith.mulf %133, %133 : vector<16x128xf32>
    %cst_65 = arith.constant dense<0.000000e+00> : vector<16xf32>
    %135 = vector.multi_reduction <add>, %134, %cst_65 [1] : vector<16x128xf32> to vector<16xf32>
    %136 = vector.shape_cast %135 : vector<16xf32> to vector<16x1xf32>
    %cst_66 = arith.constant 1.280000e+02 : f32
    %137 = vector.broadcast %cst_66 : f32 to vector<16x1xf32>
    %138 = arith.divf %136, %137 : vector<16x1xf32>
    %139 = vector.broadcast %131 : vector<16x1xf32> to vector<16x128xf32>
    %140 = arith.subf %123, %139 : vector<16x128xf32>
    %cst_67 = arith.constant 9.99999996E-13 : f32
    %141 = vector.broadcast %cst_67 : f32 to vector<16x1xf32>
    %142 = arith.addf %138, %141 : vector<16x1xf32>
    %143 = math.rsqrt %142 : vector<16x1xf32>
    %144 = vector.broadcast %143 : vector<16x1xf32> to vector<16x128xf32>
    %145 = arith.mulf %140, %144 : vector<16x128xf32>
    %146 = vector.broadcast %125 : vector<1x128xf32> to vector<16x128xf32>
    %147 = arith.mulf %145, %146 : vector<16x128xf32>
    %148 = vector.broadcast %127 : vector<1x128xf32> to vector<16x128xf32>
    %149 = arith.addf %147, %148 : vector<16x128xf32>
    %c0_68 = arith.constant 0 : index
    %c0_69 = arith.constant 0 : index
    %150 = vector.load %arg26[%c0_68, %c0_69] : memref<16x128xf32, #tpu.memory_space<vmem>>, vector<16x128xf32>
    tpu.vector_store %arg26[%c0_68, %c0_69], %149 {strides = array<i32>} : memref<16x128xf32, #tpu.memory_space<vmem>>, vector<16x128xf32>,
    %c1_i32 = arith.constant 1 : i32
    %151 = arith.cmpi eq, %arg0, %c1_i32 : i32
    %152 = arith.extui %151 : i1 to i32
    %c0_i32_70 = arith.constant 0 : i32
    %153 = arith.cmpi ne, %152, %c0_i32_70 : i32
    scf.if %153 {
      %154 = vector.shape_cast %149 : vector<16x128xf32> to vector<2x8x128xf32>
      %155 = vector.extract_strided_slice %154 {offsets = [0, 0, 0], sizes = [2, 1, 128], strides = [1, 1, 1]} : vector<2x8x128xf32> to vector<2x1x128xf32>
      %156 = vector.shape_cast %155 : vector<2x1x128xf32> to vector<2x128xf32>
      %c0_71 = arith.constant 0 : index
      %c0_72 = arith.constant 0 : index
      %157 = vector.load %arg17[%c0_71, %c0_72] : memref<128x128xf32, #tpu.memory_space<vmem>>, vector<128x128xf32>
      %cst_73 = arith.constant dense<0.000000e+00> : vector<2x128xf32>
      %158 = tpu.matmul %156, %157, %cst_73 {dimension_numbers = #tpu.dot_dimension_numbers<[1], [0], [0], [1], [0, 0, 1, 1], [], []>} : vector<2x128xf32>, vector<128x128xf32>, vector<2x128xf32> -> vector<2x128xf32>
      %c0_74 = arith.constant 0 : index
      %c0_75 = arith.constant 0 : index
      %159 = vector.load %arg18[%c0_74, %c0_75] : memref<1x128xf32, #tpu.memory_space<vmem>>, vector<1x128xf32>
      %160 = vector.broadcast %159 : vector<1x128xf32> to vector<2x128xf32>
      %161 = arith.addf %158, %160 : vector<2x128xf32>
      %162 = math.tanh %161 : vector<2x128xf32>
      %c0_76 = arith.constant 0 : index
      %c0_77 = arith.constant 0 : index
      %163 = vector.load %arg19[%c0_76, %c0_77] : memref<128x512xf32, #tpu.memory_space<vmem>>, vector<128x512xf32>
      %cst_78 = arith.constant dense<0.000000e+00> : vector<2x512xf32>
      %164 = tpu.matmul %162, %163, %cst_78 {dimension_numbers = #tpu.dot_dimension_numbers<[1], [0], [0], [1], [0, 0, 1, 1], [], []>} : vector<2x128xf32>, vector<128x512xf32>, vector<2x512xf32> -> vector<2x512xf32>
      %c0_79 = arith.constant 0 : index
      %c0_80 = arith.constant 0 : index
      %165 = vector.load %arg20[%c0_79, %c0_80] : memref<1x512xf32, #tpu.memory_space<vmem>>, vector<1x512xf32>
      %166 = vector.broadcast %165 : vector<1x512xf32> to vector<2x512xf32>
      %167 = arith.addf %164, %166 : vector<2x512xf32>
      %168 = vector.extract_strided_slice %167 {offsets = [0, 0], sizes = [2, 128], strides = [1, 1]} : vector<2x512xf32> to vector<2x128xf32>
      %169 = arith.negf %168 : vector<2x128xf32>
      %170 = math.exp %169 : vector<2x128xf32>
      %cst_81 = arith.constant 1.000000e+00 : f32
      %171 = vector.broadcast %cst_81 : f32 to vector<2x128xf32>
      %172 = arith.addf %171, %170 : vector<2x128xf32>
      %173 = arith.divf %171, %172 : vector<2x128xf32>
      %174 = vector.extract_strided_slice %167 {offsets = [0, 256], sizes = [2, 128], strides = [1, 1]} : vector<2x512xf32> to vector<2x128xf32>
      %175 = math.tanh %174 : vector<2x128xf32>
      %176 = vector.extract_strided_slice %167 {offsets = [0, 384], sizes = [2, 128], strides = [1, 1]} : vector<2x512xf32> to vector<2x128xf32>
      %177 = arith.negf %176 : vector<2x128xf32>
      %178 = math.exp %177 : vector<2x128xf32>
      %cst_82 = arith.constant 1.000000e+00 : f32
      %179 = vector.broadcast %cst_82 : f32 to vector<2x128xf32>
      %180 = arith.addf %179, %178 : vector<2x128xf32>
      %181 = arith.divf %179, %180 : vector<2x128xf32>
      %182 = arith.mulf %173, %175 : vector<2x128xf32>
      %183 = math.tanh %182 : vector<2x128xf32>
      %184 = arith.mulf %181, %183 : vector<2x128xf32>
      %c0_83 = arith.constant 0 : index
      %c0_84 = arith.constant 0 : index
      %185 = vector.load %arg21[%c0_83, %c0_84] : memref<128x128xf32, #tpu.memory_space<vmem>>, vector<128x128xf32>
      %cst_85 = arith.constant dense<0.000000e+00> : vector<2x128xf32>
      %186 = tpu.matmul %184, %185, %cst_85 {dimension_numbers = #tpu.dot_dimension_numbers<[1], [0], [0], [1], [0, 0, 1, 1], [], []>} : vector<2x128xf32>, vector<128x128xf32>, vector<2x128xf32> -> vector<2x128xf32>
      %c0_86 = arith.constant 0 : index
      %c0_87 = arith.constant 0 : index
      %187 = vector.load %arg22[%c0_86, %c0_87] : memref<1x128xf32, #tpu.memory_space<vmem>>, vector<1x128xf32>
      %188 = vector.broadcast %187 : vector<1x128xf32> to vector<2x128xf32>
      %189 = arith.addf %186, %188 : vector<2x128xf32>
      %cst_88 = arith.constant 0.000000e+00 : f32
      %190 = vector.broadcast %cst_88 : f32 to vector<2x128xf32>
      %191 = arith.maximumf %189, %190 : vector<2x128xf32>
      %c0_89 = arith.constant 0 : index
      %c0_90 = arith.constant 0 : index
      %192 = vector.load %arg23[%c0_89, %c0_90] : memref<128x128xf32, #tpu.memory_space<vmem>>, vector<128x128xf32>
      %cst_91 = arith.constant dense<0.000000e+00> : vector<2x128xf32>
      %193 = tpu.matmul %191, %192, %cst_91 {dimension_numbers = #tpu.dot_dimension_numbers<[1], [0], [0], [1], [0, 0, 1, 1], [], []>} : vector<2x128xf32>, vector<128x128xf32>, vector<2x128xf32> -> vector<2x128xf32>
      %c0_92 = arith.constant 0 : index
      %c0_93 = arith.constant 0 : index
      %194 = vector.load %arg24[%c0_92, %c0_93] : memref<1x128xf32, #tpu.memory_space<vmem>>, vector<1x128xf32>
      %195 = vector.broadcast %194 : vector<1x128xf32> to vector<2x128xf32>
      %196 = arith.addf %193, %195 : vector<2x128xf32>
      %c0_94 = arith.constant 0 : index
      %c0_95 = arith.constant 0 : index
      %197 = vector.load %arg25[%c0_94, %c0_95] : memref<2x128xf32, #tpu.memory_space<vmem>>, vector<2x128xf32>
      tpu.vector_store %arg25[%c0_94, %c0_95], %196 {strides = array<i32>} : memref<2x128xf32, #tpu.memory_space<vmem>>, vector<2x128xf32>,
    } else {
    }
    return
  }
  func.func @transform_0(%arg0: i32) -> (i32, i32) {
    %c0_i32 = arith.constant 0 : i32
    %c0_i32_0 = arith.constant 0 : i32
    %c0_i32_1 = arith.constant 0 : i32
    return %c0_i32, %c0_i32_0 : i32, i32
  }
  func.func @transform_1(%arg0: i32) -> (i32, i32, i32) {
    %c0_i32 = arith.constant 0 : i32
    %c0_i32_0 = arith.constant 0 : i32
    %c0_i32_1 = arith.constant 0 : i32
    %c0_i32_2 = arith.constant 0 : i32
    return %c0_i32, %c0_i32_0, %c0_i32_1 : i32, i32, i32
  }
  func.func @transform_2(%arg0: i32) -> (i32, i32) {
    %c0_i32 = arith.constant 0 : i32
    %c0_i32_0 = arith.constant 0 : i32
    %c0_i32_1 = arith.constant 0 : i32
    return %c0_i32, %c0_i32_0 : i32, i32
  }
  func.func @transform_3(%arg0: i32) -> (i32, i32) {
    %c0_i32 = arith.constant 0 : i32
    %c0_i32_0 = arith.constant 0 : i32
    %c0_i32_1 = arith.constant 0 : i32
    return %c0_i32, %c0_i32_0 : i32, i32
  }
  func.func @transform_4(%arg0: i32) -> (i32, i32, i32) {
    %c0_i32 = arith.constant 0 : i32
    %c0_i32_0 = arith.constant 0 : i32
    %c0_i32_1 = arith.constant 0 : i32
    return %arg0, %c0_i32, %c0_i32_0 : i32, i32, i32
  }
  func.func @transform_5(%arg0: i32) -> (i32, i32, i32) {
    %c0_i32 = arith.constant 0 : i32
    %c0_i32_0 = arith.constant 0 : i32
    %c0_i32_1 = arith.constant 0 : i32
    return %arg0, %c0_i32, %c0_i32_0 : i32, i32, i32
  }
  func.func @transform_6(%arg0: i32) -> (i32, i32, i32) {
    %c0_i32 = arith.constant 0 : i32
    %c0_i32_0 = arith.constant 0 : i32
    %c0_i32_1 = arith.constant 0 : i32
    return %arg0, %c0_i32, %c0_i32_0 : i32, i32, i32
  }
  func.func @transform_7(%arg0: i32) -> (i32, i32, i32) {
    %c0_i32 = arith.constant 0 : i32
    %c0_i32_0 = arith.constant 0 : i32
    %c0_i32_1 = arith.constant 0 : i32
    return %arg0, %c0_i32, %c0_i32_0 : i32, i32, i32
  }
  func.func @transform_8(%arg0: i32) -> (i32, i32, i32) {
    %c0_i32 = arith.constant 0 : i32
    %c0_i32_0 = arith.constant 0 : i32
    %c0_i32_1 = arith.constant 0 : i32
    return %arg0, %c0_i32, %c0_i32_0 : i32, i32, i32
  }
  func.func @transform_9(%arg0: i32) -> (i32, i32, i32) {
    %c0_i32 = arith.constant 0 : i32
    %c0_i32_0 = arith.constant 0 : i32
    %c0_i32_1 = arith.constant 0 : i32
    return %arg0, %c0_i32, %c0_i32_0 : i32, i32, i32
  }
  func.func @transform_10(%arg0: i32) -> (i32, i32, i32) {
    %c0_i32 = arith.constant 0 : i32
    %c0_i32_0 = arith.constant 0 : i32
    %c0_i32_1 = arith.constant 0 : i32
    return %arg0, %c0_i32, %c0_i32_0 : i32, i32, i32
  }
  func.func @transform_11(%arg0: i32) -> (i32, i32, i32) {
    %c0_i32 = arith.constant 0 : i32
    %c0_i32_0 = arith.constant 0 : i32
    %c0_i32_1 = arith.constant 0 : i32
    return %arg0, %c0_i32, %c0_i32_0 : i32, i32, i32
  }
  func.func @transform_12(%arg0: i32) -> (i32, i32, i32) {
    %c0_i32 = arith.constant 0 : i32
    %c0_i32_0 = arith.constant 0 : i32
    %c0_i32_1 = arith.constant 0 : i32
    return %arg0, %c0_i32, %c0_i32_0 : i32, i32, i32
  }
  func.func @transform_13(%arg0: i32) -> (i32, i32, i32) {
    %c0_i32 = arith.constant 0 : i32
    %c0_i32_0 = arith.constant 0 : i32
    %c0_i32_1 = arith.constant 0 : i32
    return %arg0, %c0_i32, %c0_i32_0 : i32, i32, i32
  }
  func.func @transform_14(%arg0: i32) -> (i32, i32, i32) {
    %c0_i32 = arith.constant 0 : i32
    %c0_i32_0 = arith.constant 0 : i32
    %c0_i32_1 = arith.constant 0 : i32
    return %arg0, %c0_i32, %c0_i32_0 : i32, i32, i32
  }
  func.func @transform_15(%arg0: i32) -> (i32, i32, i32) {
    %c0_i32 = arith.constant 0 : i32
    %c0_i32_0 = arith.constant 0 : i32
    %c0_i32_1 = arith.constant 0 : i32
    return %arg0, %c0_i32, %c0_i32_0 : i32, i32, i32
  }
  func.func @transform_16(%arg0: i32) -> (i32, i32) {
    %c0_i32 = arith.constant 0 : i32
    %c0_i32_0 = arith.constant 0 : i32
    %c0_i32_1 = arith.constant 0 : i32
    return %c0_i32, %c0_i32_0 : i32, i32
  }
  func.func @transform_17(%arg0: i32) -> (i32, i32) {
    %c0_i32 = arith.constant 0 : i32
    %c0_i32_0 = arith.constant 0 : i32
    %c0_i32_1 = arith.constant 0 : i32
    return %c0_i32, %c0_i32_0 : i32, i32
  }
  func.func @transform_18(%arg0: i32) -> (i32, i32) {
    %c0_i32 = arith.constant 0 : i32
    %c0_i32_0 = arith.constant 0 : i32
    %c0_i32_1 = arith.constant 0 : i32
    return %c0_i32, %c0_i32_0 : i32, i32
  }
  func.func @transform_19(%arg0: i32) -> (i32, i32) {
    %c0_i32 = arith.constant 0 : i32
    %c0_i32_0 = arith.constant 0 : i32
    %c0_i32_1 = arith.constant 0 : i32
    return %c0_i32, %c0_i32_0 : i32, i32
  }
  func.func @transform_20(%arg0: i32) -> (i32, i32) {
    %c0_i32 = arith.constant 0 : i32
    %c0_i32_0 = arith.constant 0 : i32
    %c0_i32_1 = arith.constant 0 : i32
    return %c0_i32, %c0_i32_0 : i32, i32
  }
  func.func @transform_21(%arg0: i32) -> (i32, i32) {
    %c0_i32 = arith.constant 0 : i32
    %c0_i32_0 = arith.constant 0 : i32
    %c0_i32_1 = arith.constant 0 : i32
    return %c0_i32, %c0_i32_0 : i32, i32
  }
  func.func @transform_22(%arg0: i32) -> (i32, i32) {
    %c0_i32 = arith.constant 0 : i32
    %c0_i32_0 = arith.constant 0 : i32
    %c0_i32_1 = arith.constant 0 : i32
    return %c0_i32, %c0_i32_0 : i32, i32
  }
  func.func @transform_23(%arg0: i32) -> (i32, i32) {
    %c0_i32 = arith.constant 0 : i32
    %c0_i32_0 = arith.constant 0 : i32
    %c0_i32_1 = arith.constant 0 : i32
    return %c0_i32, %c0_i32_0 : i32, i32
  }
  func.func @transform_24(%arg0: i32) -> (i32, i32) {
    %c0_i32 = arith.constant 0 : i32
    %c0_i32_0 = arith.constant 0 : i32
    %c0_i32_1 = arith.constant 0 : i32
    return %c0_i32, %c0_i32_0 : i32, i32
  }
}

</mosaic_0001>

<bundles_post_ra>
// kernel: predict_sentiment.1
= control target key start
LH: loop header
LB: loop body
LE: loop exit
PB: predicated region body
PF: predicated region fallthrough
CT: control target
= control target key end

     0   :  { %s4143_s0 = inlined_call_operand.vmem [shape: f32[16,128], index: 0, kind: input, shape index: {}]   ;;  %s4144_s1 = inlined_call_operand.vmem [shape: f32[2,1,8], index: 1, kind: input, shape index: {}]   ;;  %s4145_s2 = inlined_call_operand.vmem [shape: f32[1,128], index: 2, kind: input, shape index: {}]   ;;  %s4146_s3 = inlined_call_operand.vmem [shape: f32[1,128], index: 3, kind: input, shape index: {}]   ;;  %s4147_s4 = inlined_call_operand.hbm [shape: bf16[2,128,384], index: 4, kind: input, shape index: {}]   ;;  %s4148_s5 = inlined_call_operand.vmem [shape: f32[2,1,384], index: 5, kind: input, shape index: {}]   ;;  %s4149_s6 = inlined_call_operand.vmem [shape: bf16[2,128,128], index: 6, kind: input, shape index: {}]   ;;  %s4150_s7 = inlined_call_operand.vmem [shape: f32[2,1,128], index: 7, kind: input, shape index: {}]   ;;  %s4151_s8 = inlined_call_operand.vmem [shape: f32[2,1,128], index: 8, kind: input, shape index: {}]   ;;  %s4152_s9 = inlined_call_operand.vmem [shape: f32[2,1,128], index: 9, kind: input, shape index: {}]   ;;  %s4153_s10 = inlined_call_operand.hbm [shape: bf16[2,128,256], index: 10, kind: input, shape index: {}]   ;;  %s4154_s11 = inlined_call_operand.vmem [shape: f32[2,1,256], index: 11, kind: input, shape index: {}]   ;;  %s4155_s12 = inlined_call_operand.hbm [shape: bf16[2,256,128], index: 12, kind: input, shape index: {}]   ;;  %s4156_s13 = inlined_call_operand.vmem [shape: f32[2,1,128], index: 13, kind: input, shape index: {}]   ;;  %s4157_s14 = inlined_call_operand.vmem [shape: f32[2,1,128], index: 14, kind: input, shape index: {}]   ;;  %s4158_s15 = inlined_call_operand.vmem [shape: f32[2,1,128], index: 15, kind: input, shape index: {}]   ;;  %s4159_s16 = inlined_call_operand.hbm [shape: f32[128,128], index: 16, kind: input, shape index: {}]   ;;  %s4160_s17 = inlined_call_operand.vmem [shape: f32[1,128], index: 17, kind: input, shape index: {}]   ;;  %s4161_s18 = inlined_call_operand.hbm [shape: f32[128,512], index: 18, kind: input, shape index: {}]   ;;  %s4162_s19 = inlined_call_operand.vmem [shape: f32[1,512], index: 19, kind: input, shape index: {}]   ;;  %s4163_s20 = inlined_call_operand.hbm [shape: f32[128,128], index: 20, kind: input, shape index: {}]   ;;  %s4164_s21 = inlined_call_operand.vmem [shape: f32[1,128], index: 21, kind: input, shape index: {}]   ;;  %s4165_s22 = inlined_call_operand.hbm [shape: f32[128,128], index: 22, kind: input, shape index: {}]   ;;  %s4166_s23 = inlined_call_operand.vmem [shape: f32[1,128], index: 23, kind: input, shape index: {}]   ;;  %s4167_s24 = inlined_call_operand.hbm [shape: f32[2,128], index: 24, kind: output, shape index: {}]  }
   0x1   :  { %4178 = sst [smem:[#allocation24_spill]] %s4143_s0 }
   0x2   :  { %4179 = sst [smem:[#allocation25_spill]] %s4144_s1 }
   0x3   :  { %4180 = sst [smem:[#allocation26_spill]] %s4145_s2 }
   0x4   :  { %4181 = sst [smem:[#allocation27_spill]] %s4146_s3 }
   0x5   :  { %4182 = sst [smem:[#allocation28_spill]] %s4147_s4 }
   0x6   :  { %4183 = sst [smem:[#allocation29_spill]] %s4148_s5 }
   0x7   :  { %4184 = sst [smem:[#allocation30_spill]] %s4149_s6 }
   0x8   :  { %4185 = sst [smem:[#allocation31_spill]] %s4150_s7 }
   0x9   :  { %4186 = sst [smem:[#allocation32_spill]] %s4151_s8 }
   0xa   :  { %4187 = sst [smem:[#allocation33_spill]] %s4153_s10 }
   0xb   :  { %4188 = sst [smem:[#allocation34_spill]] %s4155_s12 }
   0xc   :  { %4189 = sst [smem:[#allocation35_spill]] %s4156_s13 }
   0xd   :  { %4190 = sst [smem:[#allocation36_spill]] %s4157_s14 }
   0xe   :  { %4191 = sst [smem:[#allocation37_spill]] %s4158_s15 }
   0xf   :  { %4192 = sst [smem:[#allocation38_spill]] %s4159_s16 }
  0x10   :  { %4193 = sst [smem:[#allocation39_spill]] %s4160_s17 }
  0x11   :  { %4194 = sst [smem:[#allocation40_spill]] %s4161_s18 }
  0x12   :  { %4195 = sst [smem:[#allocation41_spill]] %s4162_s19 }
  0x13   :  { %4196 = sst [smem:[#allocation42_spill]] %s4163_s20 }
  0x14   :  { %4197 = sst [smem:[#allocation43_spill]] %s4164_s21 }
  0x15   :  { %4198 = sst [smem:[#allocation44_spill]] %s4166_s23 }
  0x16   :  { %4199 = sst [smem:[#allocation45_spill]] %s4167_s24 }
  0x17   :  { %29 = vsyncpa [#allocation4], 0 }
  0x18   :  { %31 = vsyncpa [#allocation4 + $0x1], 0 }
  0x19   :  { %32 = vsyncpa [#allocation7], 0 }
  0x1a   :  { %34 = vsyncpa [#allocation7 + $0x1], 0 }
  0x1b   :  { %35 = vsyncpa [#allocation10], 0 }
  0x1c   :  { %36 = vsyncpa [#allocation13], 0 }
  0x1d   :  { %37 = vsyncpa [#allocation5], 0  ;;  %s3628_s5 = smov 0   ;;  %s3630_s26 = smov 0  }
  0x1e   :  { %s3632_s27 = smov 0   ;;  %s3634_s28 = smov 0  }
  0x1f LB: > { %4200 = sst [smem:[#allocation21_spill]] %s3481_s27  ;;  %s3647_s6 = sadd.s32 4294967295, %s3485_s28   ;;  %s3485_s28 = sphi %s3634_s28, %s4238_s28   ;;  %s3481_s27 = sphi %s3632_s27, %s4240_s27   ;;  %s3477_s26 = sphi %s3630_s26, %s4242_s26   ;;  %s3473_s5 = sphi %s3628_s5, %s4241_s5  }
  0x20   : > { %p147_p0 = scmp.ne.s32.totalorder %s3477_s26, %s3473_s5  ;;  %p148_p1 = scmp.eq.s32.totalorder %s3647_s6, 0 }
  0x21   : > { %p2642_p2 = scmp.ge.s32.totalorder %s3485_s28, 1  ;;  %p633_p3 = scmp.lt.s32.totalorder %s3485_s28, 3 }
  0x22   : > { %p2643_p4 = scmp.ne.s32.totalorder %s3647_s6, 0  ;;  %p3656_p5 = por %p148_p1, %p147_p0 }
  0x23   : > { %s4202_s16 = sld [smem:[#allocation38_spill]]  ;;  %p3663_p6 = pnand %p2642_p2, %p633_p3 }
  0x24   : > { %s3487_s3 = smov [#allocation9]   ;;  %s4205_s20 = sld [smem:[#allocation42_spill]] }
  0x25   : > { %p3038_p7 = pneg %p3663_p6  ;;  %s658_s25 = sshll.u32 %s3487_s3, 4  ;;  %s659_s25 = int_to_ptr.vmem [resolvable:$true] %s658_s25 }
  0x26   : > { %s4171_s29 = smov 128   ;;  %s4173_s0 = smov 8  }
  0x27   : > { %p3671_p8 = pnand %p3038_p7, %p148_p1  ;;  %s3490_s3 = smov [#allocation12]  }
  0x28   : > { %s3689_s4 = sadd.s32 1, %s3485_s28   ;;  %s134_s1 = sadd.s32 1, %s3481_s27 }
  0x29   : > { %s656_s7 = sshll.u32 %s4202_s16, 4  ;;  %s692_s16 = sshll.u32 %s3490_s3, 4  ;;  %s657_s7 = int_to_ptr.hbm [resolvable:$true] %s656_s7  ;;  %s693_s16 = int_to_ptr.vmem [resolvable:$true] %s692_s16 }
  0x2a   : > { %s690_s5 = sshll.u32 %s4205_s20, 4  ;;  %4206 = sst [smem:[#allocation22_spill]] %s3689_s4  ;;  %s691_s5 = int_to_ptr.hbm [resolvable:$true] %s690_s5 }
  0x2b   : > { %3041 = dma.hbm_to_vmem [thread:$0]  (!%p3671_p8), %s657_s7, 2048, %s659_s25, [#allocation10], %s4171_s29, %s4171_s29, %s4173_s0  }
  0x2c   : > { %3047 = dma.hbm_to_vmem [thread:$0]  (!%p3671_p8), %s691_s5, 2048, %s693_s16, [#allocation13], %s4171_s29, %s4171_s29, %s4173_s0  }
  0x2d   : > { %s131_s20 = ssub.s32 %s3485_s28, %s3689_s4  ;;  %p141_p9 = scmp.ne.s32.totalorder %s3481_s27, %s3477_s26 }
  0x2e   : > { %p132_p10 = scmp.eq.s32.totalorder %s131_s20, 0  ;;  %p142_p11 = scmp.eq.s32.totalorder %s3485_s28, 0 }
  0x2f   : > { %p3065_p12 = scmp.lt.s32.totalorder %s3485_s28, 2  ;;  %s3699_s24 = sand.u32 1, %s3481_s27  }
  0x30   : > { %s3702_s7 = scalar_select %p132_p10, %s3481_s27, %s134_s1  }
  0x31   : > { %p143_p13 = por %p142_p11, %p141_p9  ;;  %s781_s25 = sand.u32 1, %s3485_s28  }
  0x32   : > { %4207 = sst [smem:[#allocation23_spill]] %s3702_s7  ;;  %s2649_s3 = sshll.u32 %s3699_s24, 7 }
  0x33   : > { %p3706_p0 = pnand %p3065_p12, %p143_p13  ;;  %s2941_s16 = sshll.u32 %s3485_s28, 7 }
  0x34   : > { %s785_s5 = scalar_lea.vmem [#allocation6], %s2649_s3  ;;  %s4209_s10 = sld [smem:[#allocation33_spill]] }
  0x35   : > { %s793_s29 = sshll.u32 %s785_s5, 4  ;;  %s3714_s1 = scalar_lea.sflag [#allocation7], %s781_s25  ;;  %s794_s29 = int_to_ptr.vmem [resolvable:$true] %s793_s29 }
  0x36   : > { %p3261_p3 = pneg %p3706_p0 }
  0x3a   : > { %s790_s4 = scalar_lea.hbm %s4209_s10, %s2941_s16  ;;  %s3264_s0 = scalar_lea.hbm %s4209_s10, 256 }
  0x3b   : > { %s791_s21 = sshll.u32 %s790_s4, 4  ;;  %s792_s21 = int_to_ptr.hbm [resolvable:$true] %s791_s21 }
  0x3c   : > { %s3257_s7 = sshra.s32 %s792_s21, 4  ;;  %s3258_s7 = int_to_ptr.hbm [resolvable:$true] %s3257_s7 }
  0x3d   : > { %s3259_s27 = scalar_lea.hbm %s3258_s7, 128  ;;  %p3265_p10 = scmp.lt.s32.totalorder %s3258_s7, %s4209_s10 }
  0x3e   : > { %p3260_p2 = scmp.ne.s32.totalorder %s3258_s7, %s3259_s27  ;;  %p3266_p11 = scmp.lt.s32.totalorder %s3264_s0, %s3259_s27 }
  0x40   : > { %p3262_p7 = pnand %p3261_p3, %p3260_p2  ;;  %p3267_p12 = por %p3266_p11, %p3265_p10 }
  0x42   : > { %p3263_p9 = pneg %p3262_p7 }
  0x44   : > { %p3268_p13 = pnand %p3267_p12, %p3263_p9 }
  0x46   : > { %3271 = shalt.err (!%p3268_p13)
}
  0x47   : > { %s4210_s25 = smov 8   ;;  %s4211_s17 = smov 128  }
  0x48   : > { %3057 = dma.hbm_to_vmem [thread:$0]  (!%p3706_p0), %s792_s21, 2048, %s794_s29, %s3714_s1, %s4211_s17, %s4211_s17, %s4210_s25  }
  0x49   : > { %s4212_s12 = sld [smem:[#allocation34_spill]]  ;;  %s814_s5 = scalar_lea.vmem [#allocation8], %s2649_s3 }
  0x4a   : > { %s822_s13 = sshll.u32 %s814_s5, 4  ;;  %s4213_s18 = sld [smem:[#allocation40_spill]]  ;;  %s3736_s13 = int_to_ptr.vmem [resolvable:$true] %s822_s13 }
  0x4b   : > { %s3491_s21 = smov [#allocation11]   ;;  %s3492_s14 = smov 512  }
  0x4c   : > { %s675_s29 = sshll.u32 %s3491_s21, 4  ;;  %s3493_s15 = smov 32   ;;  %s676_s29 = int_to_ptr.vmem [resolvable:$true] %s675_s29 }
  0x4d   : > { %s707_s4 = sshll.u32 %s4165_s22, 4  ;;  %s3008_s27 = smul.u32 192, %s3699_s24  ;;  %s708_s4 = int_to_ptr.hbm [resolvable:$true] %s707_s4 }
  0x4e   : > { %s3009_s7 = smul.u32 192, %s3485_s28  ;;  %s727_s3 = scalar_lea.sflag [#allocation4], %s3699_s24 }
  0x4f   : > { %s819_s19 = scalar_lea.hbm %s4212_s12, %s2941_s16 }
  0x50   : > { %s820_s20 = sshll.u32 %s819_s19, 4  ;;  %s673_s0 = sshll.u32 %s4213_s18, 4  ;;  %s3738_s20 = int_to_ptr.hbm [resolvable:$true] %s820_s20  ;;  %s674_s0 = int_to_ptr.hbm [resolvable:$true] %s673_s0 }
  0x51   : > { %3044 = dma.hbm_to_vmem [thread:$0]  (!%p3671_p8), %s674_s0, 8192, %s676_s29, [#allocation10], %s3492_s14, %s3492_s14, %s3493_s15  }
  0x52   : > { %s3494_s19 = smov [#allocation14]   ;;  %s4214_s18 = sld [smem:[#allocation28_spill]] }
  0x53   : > { %s709_s5 = sshll.u32 %s3494_s19, 4  ;;  %s730_s29 = scalar_lea.vmem [#allocation3], %s3008_s27  ;;  %s710_s5 = int_to_ptr.vmem [resolvable:$true] %s709_s5 }
  0x54   : > { %3050 = dma.hbm_to_vmem [thread:$0]  (!%p3671_p8), %s708_s4, 2048, %s710_s5, [#allocation13], %s4211_s17, %s4211_s17, %s4210_s25  }
  0x55   : > { %s738_s14 = sshll.u32 %s730_s29, 4  ;;  %s739_s14 = int_to_ptr.vmem [resolvable:$true] %s738_s14 }
  0x58   : > { %s735_s0 = scalar_lea.hbm %s4214_s18, %s3009_s7  ;;  %s3354_s8 = scalar_lea.hbm %s4214_s18, 384 }
  0x59   : > { %s736_s15 = sshll.u32 %s735_s0, 4  ;;  %s737_s15 = int_to_ptr.hbm [resolvable:$true] %s736_s15 }
  0x5a   : > { %s3347_s16 = sshra.s32 %s737_s15, 4  ;;  %s3348_s16 = int_to_ptr.hbm [resolvable:$true] %s3347_s16 }
  0x5b   : > { %s3349_s19 = scalar_lea.hbm %s3348_s16, 192  ;;  %p3355_p9 = scmp.lt.s32.totalorder %s3348_s16, %s4214_s18 }
  0x5c   : > { %p3350_p2 = scmp.ne.s32.totalorder %s3348_s16, %s3349_s19  ;;  %p3356_p10 = scmp.lt.s32.totalorder %s3354_s8, %s3349_s19 }
  0x5e   : > { %p3352_p7 = pnand %p3350_p2, %p3261_p3  ;;  %p3357_p11 = por %p3356_p10, %p3355_p9 }
  0x60   : > { %p3353_p8 = pneg %p3352_p7 }
  0x62   : > { %p3358_p12 = pnand %p3357_p11, %p3353_p8 }
  0x64   : > { %3361 = shalt.err (!%p3358_p12)
}
  0x65   : > { %s3495_s24 = smov 192   ;;  %s3496_s4 = smov 12  }
  0x66   : > { %3054 = dma.hbm_to_vmem [thread:$0]  (!%p3706_p0), %s737_s15, 3072, %s739_s14, %s727_s3, %s3495_s24, %s3495_s24, %s3496_s4  }
  0x67   : > { %s3377_s5 = sshra.s32 %s3738_s20, 4  ;;  %s3384_s0 = scalar_lea.hbm %s4212_s12, 256  ;;  %s3378_s5 = int_to_ptr.hbm [resolvable:$true] %s3377_s5 }
  0x68   : > { %s3379_s27 = scalar_lea.hbm %s3378_s5, 128  ;;  %p3385_p8 = scmp.lt.s32.totalorder %s3378_s5, %s4212_s12 }
  0x69   : > { %p3380_p13 = scmp.ne.s32.totalorder %s3378_s5, %s3379_s27  ;;  %p3386_p9 = scmp.lt.s32.totalorder %s3384_s0, %s3379_s27 }
  0x6b   : > { %p3382_p2 = pnand %p3380_p13, %p3261_p3  ;;  %p3387_p10 = por %p3386_p9, %p3385_p8 }
  0x6d   : > { %p3383_p7 = pneg %p3382_p2 }
  0x6f   : > { %p3388_p11 = pnand %p3387_p10, %p3383_p7 }
  0x71   : > { %3391 = shalt.err (!%p3388_p11)
}
  0x72   : > { %s3497_s14 = smov 64   ;;  %s3498_s15 = smov 4  }
  0x73   : > { %3060 = dma.hbm_to_vmem [thread:$0]  (!%p3706_p0), %s3738_s20, 2048, %s3736_s13, %s3714_s1, %s3497_s14, %s3497_s14, %s3498_s15  }
  0x74   : > { %852 = sbr.rel (%p3663_p6) target bundleno = 3230 (0xc9e), region = 116  ;;  %s854_s3 = sand.u32 (!%p3663_p6), 1, %s3477_s26  }
  0x75   : > { %s3010_s19 = smul.u32 (!%p3663_p6), 192, %s854_s3  ;;  %s855_s17 = scalar_lea.sflag (!%p3663_p6), [#allocation4], %s854_s3 }
  0x77   : > { %s3788_s28 = scalar_lea.vmem (!%p3663_p6), [#allocation3], %s3010_s19 }
  0x79   : > { %3452 = dma.done.wait (%p3656_p5), %s855_s17, 3072  }
  0x7a   : > { %3454 = vsyncadd (%p3656_p5), %s855_s17, 4294964224  ;;  %s864_s8 = sand.u32 1, %s3647_s6   ;;  %s2656_s23 = sshll.u32 %s854_s3, 7 }
  0x7b   : > { %s865_s13 = scalar_lea.sflag [#allocation7], %s864_s8  ;;  %s3795_s1 = scalar_lea.vmem [#allocation6], %s2656_s23 }
  0x7c   : > { %3456 = dma.done.wait (%p3656_p5), %s865_s13, 4096  }
  0x7d   : > { %3458 = vsyncadd (%p3656_p5), %s865_s13, 4294963200  ;;  %s3801_s30 = scalar_lea.vmem [#allocation8], %s2656_s23 }
  0x7e   : > { %3460 = dma.done.wait (%p148_p1), [#allocation10], 10240  }
  0x7f   : > { %3462 = vsyncadd (%p148_p1), [#allocation10], 4294957056 }
  0x80   : > { %3464 = dma.done.wait (%p148_p1), [#allocation13], 4096  }
  0x81   : > { %3466 = vsyncadd (%p148_p1), [#allocation13], 4294963200  ;;  %p1000_p6 = scmp.lt.s32.totalorder %s3647_s6, 1  ;;  %s4215_s4 = sld [smem:[#allocation30_spill]] }
  0x82   : > { %s4217_s14 = sld [smem:[#allocation29_spill]] }
  0x83   : > { %s3813_s20 = scalar_select %p1000_p6, %s3647_s6, 1 }
  0x84   : > { %s4219_s21 = sld [smem:[#allocation35_spill]] }
  0x85   : > { %s3011_s2 = smul.u32 3, %s3813_s20  ;;  %s2943_s10 = sshll.u32 %s3813_s20, 6 }
  0x86   : > { %s1017_s12 = scalar_lea.vmem %s4152_s9, %s3813_s20  ;;  %s2664_s25 = sshll.u32 %s3813_s20, 1 }
  0x87   : > { %s3820_s5 = scalar_lea.vmem %s4215_s4, %s2943_s10  ;;  %s3843_s4 = scalar_lea.vmem %s4154_s11, %s2664_s25 }
  0x88   : > { %s3829_s15 = scalar_lea.vmem %s4217_s14, %s3011_s2  ;;  %s4220_s14 = sld [smem:[#allocation36_spill]] }
  0x89   : > { %s4221_s17 = sld [smem:[#allocation37_spill]] }
  0x8a   : > { %s1024_s29 = scalar_lea.vmem %s4219_s21, %s3813_s20  ;;  %s4222_s10 = sld [smem:[#allocation24_spill]] (!%p2643_p4) }
  0x8b   : > { %1034 = sbr.rel (%p2643_p4) target bundleno = 420 (0x1a4), region = 148  ;;  %s4223_s21 = sld [smem:[#allocation26_spill]] (!%p2643_p4) }
  0x8e   : > { %s1027_s0 = scalar_lea.vmem %s4220_s14, %s3813_s20  ;;  %s4224_s14 = sld [smem:[#allocation27_spill]] (!%p2643_p4) }
  0x8f   : > { %s1030_s8 = scalar_lea.vmem %s4221_s17, %s3813_s20 }
  0x90   : > { %v1035_v0 = vld [vmem:[%s4222_s10] sm:$0xff]  ;;  %v1036_v1 = vld [vmem:[%s4222_s10 + $0x8] sm:$0xff]  ;;  %v3499_v2 = vmov 128.0  }
  0x91   : > { %1039 = vadd.xlane.f32.xlu0 %v1035_v0  ;;  %3122 = vrcp.f32 %v3499_v2  ;;  %v3120_v31 = vld [vmem:[%s4223_s21] ss:$0 sm:$0xff] }
  0x94   : > { %v3121_v34 = vld [vmem:[%s4224_s14] ss:$0 sm:$0xff] }
  0x97   : > { %v3123_v3 = vpop.eup %3122 }
  0x98   : > { %v1044_v4 = vmul.f32 128.0, %v3123_v3  ;;  %vm1048_vm0 = vweird.f32 %v3123_v3 }
  0x99   : > { %1041 = vadd.xlane.f32.xlu0 %v1036_v1 }
  0x9a   : > { %v1045_v5 = vsub.f32 1.0, %v1044_v4 }
  0x9c   : > { %v1046_v6 = vmul.f32 %v3123_v3, %v1045_v5 }
  0x9e   : > { %v1047_v7 = vadd.f32 %v3123_v3, %v1046_v6 }
  0xa0   : > { %v1049_v8 = vsel %vm1048_vm0, %v3123_v3, %v1047_v7 }
 0x104   : > { %v1040_v9 = vpop.xlane.xlu0 %1039 }
 0x105   : > { %v1050_v10 = vmul.f32 %v1049_v8, %v1040_v9 }
 0x107   : > { %v1052_v11 = vsub.f32 %v1035_v0, %v1050_v10 }
 0x109   : > { %v1054_v12 = vmul.f32 %v1052_v11, %v1052_v11 }
 0x10b   : > { %1056 = vadd.xlane.f32.xlu1 %v1054_v12 }
 0x10c   : > { %v1042_v13 = vpop.xlane.xlu0 %1041 }
 0x10d   : > { %v1051_v14 = vmul.f32 %v1049_v8, %v1042_v13 }
 0x10f   : > { %v1053_v15 = vsub.f32 %v1036_v1, %v1051_v14 }
 0x111   : > { %v1055_v16 = vmul.f32 %v1053_v15, %v1053_v15 }
 0x113   : > { %1058 = vadd.xlane.f32.xlu1 %v1055_v16 }
 0x17e   : > { %v1057_v17 = vpop.xlane.xlu1 %1056 }
 0x17f   : > { %v1060_v18 = vmul.f32 %v1057_v17, %v1049_v8 }
 0x181   : > { %v1062_v19 = vadd.f32 1e-12, %v1060_v18 }
 0x183   : > { %3124 = vrsqrt.f32 %v1062_v19  ;;  %vm1070_vm2 = vweird.f32 %v1062_v19 }
 0x186   : > { %v1059_v20 = vpop.xlane.xlu1 %1058 }
 0x187   : > { %v1061_v21 = vmul.f32 %v1059_v20, %v1049_v8 }
 0x189   : > { %v3125_v22 = vpop.eup %3124  ;;  %v1063_v23 = vadd.f32 1e-12, %v1061_v21 }
 0x18a   : > { %v1065_v24 = vmul.f32 %v3125_v22, %v1062_v19  ;;  %vm1071_vm1 = vweird.f32 %v3125_v22 }
 0x18b   : > { %3126 = vrsqrt.f32 %v1063_v23  ;;  %vm1072_vm3 = vmor %vm1070_vm2, %vm1071_vm1  ;;  %vm1080_vm5 = vweird.f32 %v1063_v23 }
 0x18c   : > { %v1066_v25 = vmul.f32 %v3125_v22, %v1065_v24 }
 0x18e   : > { %v1067_v26 = vmul.f32 0.5, %v1066_v25 }
 0x190   : > { %v1068_v27 = vsub.f32 1.5, %v1067_v26 }
 0x191   : > { %v3127_v28 = vpop.eup %3126 }
 0x192   : > { %v1069_v29 = vmul.f32 %v3125_v22, %v1068_v27  ;;  %v1075_v30 = vmul.f32 %v3127_v28, %v1063_v23  ;;  %vm1081_vm4 = vweird.f32 %v3127_v28 }
 0x193   : > { %vm1082_vm6 = vmor %vm1080_vm5, %vm1081_vm4 }
 0x194   : > { %v1073_v32 = vsel %vm1072_vm3, %v3125_v22, %v1069_v29  ;;  %v1076_v33 = vmul.f32 %v3127_v28, %v1075_v30 }
 0x195   : > { %v1084_v35 = vmul.f32 %v1073_v32, %v1052_v11 }
 0x196   : > { %v1077_v36 = vmul.f32 0.5, %v1076_v33 }
 0x197   : > { %v1089_v37 = vmul.f32 %v3120_v31, %v1084_v35 }
 0x198   : > { %v1078_v38 = vsub.f32 1.5, %v1077_v36 }
 0x199   : > { %v1094_v39 = vadd.f32 %v3121_v34, %v1089_v37 }
 0x19a   : > { %v1079_v40 = vmul.f32 %v3127_v28, %v1078_v38 }
 0x19b   : > { %1096 = vst [vmem:[#allocation2] sm:$0xff] %v1094_v39 }
 0x19c   : > { %v1083_v41 = vsel %vm1082_vm6, %v3127_v28, %v1079_v40 }
 0x19d   : > { %v1085_v42 = vmul.f32 %v1083_v41, %v1053_v15 }
 0x19f   : > { %v1090_v43 = vmul.f32 %v3120_v31, %v1085_v42 }
 0x1a1   : > { %v1095_v44 = vadd.f32 %v3121_v34, %v1090_v43 }
 0x1a3   : > { %1097 = vst [vmem:[#allocation2 + $0x8] sm:$0xff] %v1095_v44 }
 0x1a4 PF: > { %v2752_v45 = vld [vmem:[%s3788_s28 + $0xa8] sm:$0xf]  ;;  %v2966_v46 = vld [vmem:[%s3788_s28 + $0xb0] sm:$0xf0]  ;;  %v2965_v47 = vld [vmem:[%s3788_s28 + $0xac] sm:$0xf] }
 0x1a5   : > { %v2753_v48 = vor.u32 %v2966_v46, %v2752_v45  ;;  %v2754_v49 = vld [vmem:[%s3788_s28 + $0xb4] sm:$0xf0]  ;;  %v2740_v50 = vld [vmem:[%s3788_s28 + $0x90] sm:$0xf]  ;;  %v2963_v51 = vld [vmem:[%s3788_s28 + $0x98] sm:$0xf0] }
 0x1a6   : > { %v2757_v52 = vor.u32 %v2965_v47, %v2754_v49  ;;  %v2962_v53 = vld [vmem:[%s3788_s28 + $0x94] sm:$0xf]  ;;  %v2742_v54 = vld [vmem:[%s3788_s28 + $0x9c] sm:$0xf0]  ;;  %v2741_v55 = vor.u32 %v2963_v51, %v2740_v50  ;;  %v2728_v57 = vld [vmem:[%s3788_s28 + $0x78] sm:$0xf] }
 0x1a7   : > { %1269 = vmatpush.bf16.msra.mxu0 %v2753_v48  ;;  %v2745_v56 = vor.u32 %v2962_v53, %v2742_v54  ;;  %v2960_v58 = vld [vmem:[%s3788_s28 + $0x80] sm:$0xf0]  ;;  %v2959_v59 = vld [vmem:[%s3788_s28 + $0x7c] sm:$0xf]  ;;  %v2730_v60 = vld [vmem:[%s3788_s28 + $0x84] sm:$0xf0] }
 0x1a8   : > { %1283 = vmatpush.bf16.msra.mxu1 %v2757_v52  ;;  %v2729_v61 = vor.u32 %v2960_v58, %v2728_v57  ;;  %v2733_v62 = vor.u32 %v2959_v59, %v2730_v60  ;;  %v2716_v63 = vld [vmem:[%s3788_s28 + $0x60] sm:$0xf]  ;;  %v2957_v0 = vld [vmem:[%s3788_s28 + $0x68] sm:$0xf0]  ;;  %v2956_v1 = vld [vmem:[%s3788_s28 + $0x64] sm:$0xf] }
 0x1a9   : > { %v2718_v2 = vld [vmem:[%s3788_s28 + $0x6c] sm:$0xf0]  ;;  %v2704_v3 = vld [vmem:[%s3788_s28 + $0x48] sm:$0xf]  ;;  %v2717_v4 = vor.u32 %v2957_v0, %v2716_v63  ;;  %v2954_v5 = vld [vmem:[%s3788_s28 + $0x50] sm:$0xf0] }
 0x1aa   : > { %v2953_v6 = vld [vmem:[%s3788_s28 + $0x4c] sm:$0xf]  ;;  %v2721_v7 = vor.u32 %v2956_v1, %v2718_v2  ;;  %v2706_v8 = vld [vmem:[%s3788_s28 + $0x54] sm:$0xf0]  ;;  %v2705_v9 = vor.u32 %v2954_v5, %v2704_v3  ;;  %v2692_v11 = vld [vmem:[%s3788_s28 + $0x30] sm:$0xf] }
 0x1ab   : > { %1270 = vmatpush.bf16.msra.mxu0 %v2741_v55  ;;  %v2709_v10 = vor.u32 %v2953_v6, %v2706_v8  ;;  %v2951_v12 = vld [vmem:[%s3788_s28 + $0x38] sm:$0xf0]  ;;  %v2950_v13 = vld [vmem:[%s3788_s28 + $0x34] sm:$0xf]  ;;  %v2694_v14 = vld [vmem:[%s3788_s28 + $0x3c] sm:$0xf0] }
 0x1ac   : > { %1284 = vmatpush.bf16.msra.mxu1 %v2745_v56  ;;  %v2693_v15 = vor.u32 %v2951_v12, %v2692_v11  ;;  %v2697_v16 = vor.u32 %v2950_v13, %v2694_v14  ;;  %v2680_v17 = vld [vmem:[%s3788_s28 + $0x18] sm:$0xf]  ;;  %v2948_v18 = vld [vmem:[%s3788_s28 + $0x20] sm:$0xf0]  ;;  %v2947_v19 = vld [vmem:[%s3788_s28 + $0x1c] sm:$0xf] }
 0x1ad   : > { %v2682_v20 = vld [vmem:[%s3788_s28 + $0x24] sm:$0xf0]  ;;  %v2681_v21 = vor.u32 %v2948_v18, %v2680_v17  ;;  %v2668_v23 = vld [vmem:[%s3788_s28] sm:$0xf]  ;;  %v2945_v24 = vld [vmem:[%s3788_s28 + $0x8] sm:$0xf0] }
 0x1ae   : > { %v2685_v22 = vor.u32 %v2947_v19, %v2682_v20  ;;  %v2944_v25 = vld [vmem:[%s3788_s28 + $0x4] sm:$0xf]  ;;  %v2670_v26 = vld [vmem:[%s3788_s28 + $0xc] sm:$0xf0]  ;;  %v2669_v27 = vor.u32 %v2945_v24, %v2668_v23  ;;  %v3905_v29 = vld [vmem:[#allocation2 + $0x8] sm:$0xff]  ;;  %vm1313_vm7 = vcmask 523264  }
 0x1af   : > { %1271 = vmatpush.bf16.msra.mxu0 %v2729_v61  ;;  %v3903_v28 = vld [vmem:[#allocation2] sm:$0xff]  ;;  %v2673_v30 = vor.u32 %v2944_v25, %v2670_v26  ;;  %s3500_s3 = smov 64   ;;  %s4225_s17 = sld [smem:[#allocation25_spill]]  ;;  %vm1376_vm8 = vcmask 64512   ;;  %v2967_v47 = vld [vmem:[%s3788_s28 + $0xb8] sm:$0xf0] }
 0x1b0   : > { %1285 = vmatpush.bf16.msra.mxu1 %v2733_v62  ;;  %v3909_v31 = vpack.c.bf16 %v3905_v29, %v3903_v28  ;;  %v3914_v32 = vld [vmem:[%s3829_s15] sm:$0x7]  ;;  %v2748_v48 = vld [vmem:[%s3788_s28 + $0x98] sm:$0xf]  ;;  %v2964_v51 = vld [vmem:[%s3788_s28 + $0xa0] sm:$0xf0] }
 0x1b1   : > { %v1136_v33 = vperm.slane %v3914_v32, 1  ;;  %v1135_v34 = vperm.slane %v3914_v32, 0  ;;  %v2760_v46 = vld [vmem:[%s3788_s28 + $0xb0] sm:$0xf]  ;;  %v2749_v53 = vor.u32 %v2964_v51, %v2748_v48  ;;  %v2736_v54 = vld [vmem:[%s3788_s28 + $0x80] sm:$0xf] }
 0x1b2   : > { %v2761_v50 = vor.u32 %v2967_v47, %v2760_v46  ;;  %v2961_v55 = vld [vmem:[%s3788_s28 + $0x88] sm:$0xf0]  ;;  %v2724_v60 = vld [vmem:[%s3788_s28 + $0x68] sm:$0xf]  ;;  %v2958_v61 = vld [vmem:[%s3788_s28 + $0x70] sm:$0xf0] }
 0x1b3   : > { %1272 = vmatpush.bf16.msra.mxu0 %v2717_v4  ;;  %v2737_v59 = vor.u32 %v2961_v55, %v2736_v54  ;;  %v2725_v0 = vor.u32 %v2958_v61, %v2724_v60  ;;  %v2712_v1 = vld [vmem:[%s3788_s28 + $0x50] sm:$0xf]  ;;  %v2955_v2 = vld [vmem:[%s3788_s28 + $0x58] sm:$0xf0]  ;;  %v2700_v4 = vld [vmem:[%s3788_s28 + $0x38] sm:$0xf] }
 0x1b4   : > { %1286 = vmatpush.bf16.msra.mxu1 %v2721_v7  ;;  %1297 = vmatpush.bf16.msra.mxu2 %v2761_v50  ;;  %v2713_v3 = vor.u32 %v2955_v2, %v2712_v1  ;;  %v2952_v5 = vld [vmem:[%s3788_s28 + $0x40] sm:$0xf0]  ;;  %v2688_v7 = vld [vmem:[%s3788_s28 + $0x20] sm:$0xf]  ;;  %v2949_v8 = vld [vmem:[%s3788_s28 + $0x28] sm:$0xf0] }
 0x1b5   : > { %v3930_v43 = vld [vmem:[%s4225_s17] ss:$0 sm:$0xff]  ;;  %v3943_v56 = vld [vmem:[%s4225_s17 + $0x1] ss:$0 sm:$0xff]  ;;  %v2701_v6 = vor.u32 %v2952_v5, %v2700_v4  ;;  %v2946_v11 = vld [vmem:[%s3788_s28 + $0x10] sm:$0xf0] }
 0x1b6   : > { %v1137_v23 = vperm.slane %v3914_v32, 2  ;;  %s4226_s24 = sld [smem:[#allocation31_spill]]  ;;  %p2934_p1 = scmp.ne.s32.totalorder %s3647_s6, 1 }
 0x1b7   : > { %1273 = vmatpush.bf16.msra.mxu0 %v2705_v9  ;;  %v2689_v9 = vor.u32 %v2949_v8, %v2688_v7  ;;  %v2974_v7 = vld [vmem:[%s3820_s5 + $0x30] sm:$0xff]  ;;  %v2973_v8 = vld [vmem:[%s3820_s5 + $0x28] sm:$0xff]  ;;  %s4228_s7 = sld [smem:[#allocation32_spill]] }
 0x1b8   : > { %1287 = vmatpush.bf16.msra.mxu1 %v2709_v10  ;;  %1298 = vmatpush.bf16.msra.mxu2 %v2749_v53  ;;  %v2676_v10 = vld [vmem:[%s3788_s28 + $0x8] sm:$0xf]  ;;  %s4234_s25 = sld [smem:[#allocation41_spill]] (!%p2934_p1) }
 0x1b9   : > { %v2677_v12 = vor.u32 %v2946_v11, %v2676_v10  ;;  %v2971_v10 = vld [vmem:[%s3820_s5 + $0x18] sm:$0xff]  ;;  %v2970_v11 = vld [vmem:[%s3820_s5 + $0x10] sm:$0xff] }
 0x1bb   : > { %1274 = vmatpush.bf16.msra.mxu0 %v2693_v15 }
 0x1bc   : > { %1288 = vmatpush.bf16.msra.mxu1 %v2697_v16  ;;  %1299 = vmatpush.bf16.msra.mxu2 %v2737_v59  ;;  %s4227_s27 = scalar_lea.vmem %s4226_s24, %s3813_s20 }
 0x1bd   : > { %s4229_s21 = scalar_lea.vmem %s4228_s7, %s3813_s20 }
 0x1bf   : > { %1275 = vmatpush.bf16.msra.mxu0 %v2681_v21 }
 0x1c0   : > { %1289 = vmatpush.bf16.msra.mxu1 %v2685_v22  ;;  %1300 = vmatpush.bf16.msra.mxu2 %v2725_v0 }
 0x1c3   : > { %1276 = vmatpush.bf16.msra.mxu0 %v2669_v27 }
 0x1c4   : > { %1290 = vmatpush.bf16.msra.mxu1 %v2673_v30  ;;  %1301 = vmatpush.bf16.msra.mxu2 %v2713_v3 }
 0x1c6   : > { %1277 = vmatmul.bf16.vlgmr.msra.gmra.mxu0 %v3909_v31 }
 0x1c7   : > { %1291 = vmatmul.bf16.vlgmr.msra.gmra.mxu1 %v3909_v31 }
 0x1c8   : > { %1302 = vmatpush.bf16.msra.mxu2 %v2701_v6  ;;  %v2975_v6 = vld [vmem:[%s3820_s5 + $0x38] sm:$0xff] }
 0x1cc   : > { %1303 = vmatpush.bf16.msra.mxu2 %v2689_v9  ;;  %v2972_v9 = vld [vmem:[%s3820_s5 + $0x20] sm:$0xff] }
 0x1d0   : > { %1304 = vmatpush.bf16.msra.mxu2 %v2677_v12  ;;  %v2969_v12 = vld [vmem:[%s3820_s5 + $0x8] sm:$0xff] }
 0x1d3   : > { %1305 = vmatmul.bf16.vlgmr.msra.gmra.mxu2 %v3909_v31 }
 0x1d4   : > { %1660 = vmatpush.bf16.msrb.mxu2 %v2975_v6  ;;  %v2983_v6 = vld [vmem:[%s3795_s1 + $0x34] sm:$0xf0] }
 0x1d8   : > { %1661 = vmatpush.bf16.msrb.mxu2 %v2974_v7  ;;  %v2982_v7 = vld [vmem:[%s3795_s1 + $0x34] sm:$0xf] }
 0x1dc   : > { %1662 = vmatpush.bf16.msrb.mxu2 %v2973_v8 }
 0x1e0   : > { %1663 = vmatpush.bf16.msrb.mxu2 %v2972_v9  ;;  %v2834_v9 = vld [vmem:[%s3795_s1 + $0x38] sm:$0xf0] }
 0x1e4   : > { %1664 = vmatpush.bf16.msrb.mxu2 %v2971_v10  ;;  %v2837_v10 = vor.u32 %v2982_v7, %v2834_v9  ;;  %v3001_v7 = vld [vmem:[%s3801_s30 + $0x48] sm:$0xff]  ;;  %v2994_v9 = vld [vmem:[%s3801_s30 + $0x10] sm:$0xff] }
 0x1e8   : > { %1665 = vmatpush.bf16.msrb.mxu2 %v2970_v11  ;;  %v2824_v11 = vld [vmem:[%s3795_s1 + $0x20] sm:$0xf] }
 0x1ec   : > { %1666 = vmatpush.bf16.msrb.mxu2 %v2969_v12  ;;  %v2981_v12 = vld [vmem:[%s3795_s1 + $0x24] sm:$0xf0] }
 0x243   : > { %v1278_v35 = vpop.f32.mrf.mxu0 }
 0x244   : > { %v1292_v36 = vpop.f32.mrf.mxu1  ;;  %v1279_v38 = vadd.f32 %v1278_v35, %v1135_v34 }
 0x245   : > { %v1293_v37 = vadd.f32 %v1292_v36, %v1136_v33 }
 0x247   : > { %1447 = vrot.lane.b32.xlu2 %v1293_v37, %s3500_s3  ;;  %2762 = vmatpush.xpose.msk.msra.mxu3 %vm1313_vm7, %v1293_v37 }
 0x24a   : > { %2763 = vmatmul.msk.f32.vlgmr.msra.gmra.mxu3 %vm1313_vm7, %v1279_v38 }
 0x24b   : > { %v1280_v40 = vpop.f32.mrf.mxu0 }
 0x24c   : > { %v1294_v39 = vpop.f32.mrf.mxu1  ;;  %v3923_v42 = vadd.f32 %v1280_v40, %v1135_v34 }
 0x24d   : > { %v1295_v41 = vadd.f32 %v1294_v39, %v1136_v33 }
 0x24f   : > { %2764 = vmatpush.xpose.msk.msrb.mxu3 %vm1313_vm7, %v1295_v41  ;;  %1445 = vrot.lane.b32.xlu2 %v1279_v38, %s3500_s3 }
 0x252   : > { %2765 = vmatmul.msk.f32.vlgmr.msrb.gmra.mxu3 %vm1313_vm7, %v3923_v42 }
 0x256   : > { %v1306_v24 = vpop.f32.mrf.mxu2 }
 0x257   : > { %v1307_v25 = vadd.f32 %v1306_v24, %v1137_v23 }
 0x259   : > { %1417 = vmatpush.msra.mxu3 %v1307_v25 }
 0x25e   : > { %v1308_v26 = vpop.f32.mrf.mxu2 }
 0x25f   : > { %v1309_v27 = vadd.f32 %v1308_v26, %v1137_v23  ;;  %v3140_v23 = vld [vmem:[%s4227_s27] ss:$0 sm:$0xff] }
 0x261   : > { %v3128_v30 = vpack.i.bf16 %v1309_v27, %v1307_v25  ;;  %1440 = vmatpush.msrb.mxu3 %v1309_v27 }
 0x2a1   : > { %v1448_v36 = vpop.permute.xlu2 %1447 }
 0x2a9   : > { %v1446_v39 = vpop.permute.xlu2 %1445 }
 0x2cd   : > { %v1337_v44 = vpop.f32.mrf.mxu3 }
 0x2ce   : > { %v1366_v45 = vmul.f32 0.125, %v1337_v44 }
 0x2d0   : > { %v1374_v49 = vadd.f32 %v3930_v43, %v1366_v45 }
 0x2d2   : > { %v1377_v52 = vsel %vm1376_vm8, %v1374_v49, -inf }
 0x2d3   : > { %1378 = vmax.xlane.f32.xlu0 %v1377_v52 }
 0x2d5   : > { %v1363_v57 = vpop.f32.mrf.mxu3 }
 0x2d6   : > { %v1367_v58 = vmul.f32 0.125, %v1363_v57 }
 0x2d8   : > { %v1375_v62 = vadd.f32 %v3943_v56, %v1367_v58 }
 0x2da   : > { %v1380_v63 = vsel %vm1376_vm8, %v1375_v62, -inf }
 0x2db   : > { %1381 = vmax.xlane.f32.xlu0 %v1380_v63 }
 0x2ef   : > { %1475 = vrot.lane.b32.xlu0 %v1295_v41, %s3500_s3 }
 0x346   : > { %v1379_v13 = vpop.xlane.xlu0 %1378 }
 0x347   : > { %v1383_v14 = vsub.f32 %v1374_v49, %v1379_v13 }
 0x349   : > { %v1385_v15 = vmul.f32 1.442695, %v1383_v14 }
 0x34b   : > { %3146 = vpow2.f32 %v1385_v15 }
 0x34e   : > { %v1382_v16 = vpop.xlane.xlu0 %1381 }
 0x34f   : > { %v1384_v17 = vsub.f32 %v1375_v62, %v1382_v16  ;;  %v2968_v16 = vld [vmem:[%s3820_s5] sm:$0xff] }
 0x350   : > { %1667 = vmatpush.bf16.msrb.mxu2 %v2968_v16 }
 0x351   : > { %v3147_v18 = vpop.eup %3146  ;;  %v1387_v19 = vmul.f32 1.442695, %v1384_v17 }
 0x352   : > { %v1389_v20 = vsel %vm1376_vm8, %v3147_v18, 0.0 }
 0x353   : > { %3148 = vpow2.f32 %v1387_v19  ;;  %1390 = vadd.xlane.f32.xlu1 %v1389_v20 }
 0x359   : > { %v3149_v21 = vpop.eup %3148 }
 0x35a   : > { %v1392_v22 = vsel %vm1376_vm8, %v3149_v21, 0.0 }
 0x35b   : > { %1393 = vadd.xlane.f32.xlu1 %v1392_v22 }
 0x361   : > { %v1476_v38 = vpop.permute.xlu0 %1475 }
 0x374   : > { %1473 = vrot.lane.b32.xlu1 %v3923_v42, %s3500_s3 }
 0x3c6   : > { %v1391_v31 = vpop.xlane.xlu1 %1390 }
 0x3c7   : > { %3150 = vrcp.f32 %v1391_v31 }
 0x3cd   : > { %v3151_v33 = vpop.eup %3150 }
 0x3ce   : > { %v1397_v34 = vmul.f32 %v3151_v33, %v3147_v18  ;;  %v1394_v35 = vpop.xlane.xlu1 %1393  ;;  %v3501_v33 = vmov 128.0  }
 0x3cf   : > { %3152 = vrcp.f32 %v1394_v35 }
 0x3d0   : > { %2766 = vmatmul.msk.f32.vlgmr.msra.gmra.mxu3 %vm1376_vm8, %v1397_v34 }
 0x3d1   : > { %2768 = vmatpush.xpose.msk.msra.mxu3 %vm1313_vm7, %v1448_v36 }
 0x3d5   : > { %v3153_v32 = vpop.eup %3152 }
 0x3d6   : > { %v1398_v37 = vmul.f32 %v3153_v32, %v3149_v21 }
 0x3d8   : > { %2767 = vmatmul.msk.f32.vlgmr.msrb.gmra.mxu3 %vm1376_vm8, %v1398_v37 }
 0x3d9   : > { %2770 = vmatpush.xpose.msk.msrb.mxu3 %vm1313_vm7, %v1476_v38 }
 0x3e0   : > { %2769 = vmatmul.msk.f32.vlgmr.msra.gmra.mxu3 %vm1313_vm7, %v1446_v39 }
 0x3e6   : > { %v1474_v40 = vpop.permute.xlu1 %1473 }
 0x3e8   : > { %2771 = vmatmul.msk.f32.vlgmr.msrb.gmra.mxu3 %vm1313_vm7, %v1474_v40 }
 0x453   : > { %v3970_v41 = vpop.f32.mrf.mxu3 }
 0x45b   : > { %v3972_v42 = vpop.f32.mrf.mxu3 }
 0x463   : > { %v1470_v44 = vpop.f32.mrf.mxu3 }
 0x464   : > { %v1501_v45 = vmul.f32 0.125, %v1470_v44 }
 0x466   : > { %v1503_v46 = vadd.f32 %v3930_v43, %v1501_v45 }
 0x468   : > { %v1505_v47 = vsel %vm1376_vm8, %v1503_v46, -inf }
 0x469   : > { %1506 = vmax.xlane.f32.xlu2 %v1505_v47  ;;  %v2991_v47 = vld [vmem:[%s3795_s1 + $0x74] sm:$0xf0] }
 0x46b   : > { %v1498_v48 = vpop.f32.mrf.mxu3 }
 0x46c   : > { %v1502_v49 = vmul.f32 0.125, %v1498_v48  ;;  %v2990_v48 = vld [vmem:[%s3795_s1 + $0x74] sm:$0xf] }
 0x46e   : > { %v1504_v50 = vadd.f32 %v3943_v56, %v1502_v49 }
 0x470   : > { %v1508_v51 = vsel %vm1376_vm8, %v1504_v50, -inf }
 0x471   : > { %1509 = vmax.xlane.f32.xlu0 %v1508_v51 }
 0x4dc   : > { %v1507_v52 = vpop.xlane.xlu2 %1506 }
 0x4dd   : > { %v1511_v53 = vsub.f32 %v1503_v46, %v1507_v52  ;;  %v2864_v46 = vld [vmem:[%s3795_s1 + $0x70] sm:$0xf]  ;;  %v2856_v52 = vld [vmem:[%s3795_s1 + $0x60] sm:$0xf] }
 0x4de   : > { %v2865_v49 = vor.u32 %v2991_v47, %v2864_v46 }
 0x4df   : > { %v1513_v54 = vmul.f32 1.442695, %v1511_v53  ;;  %v2989_v53 = vld [vmem:[%s3795_s1 + $0x64] sm:$0xf0] }
 0x4e0   : > { %1838 = vmatpush.bf16.msra.mxu3 %v2865_v49 }
 0x4e1   : > { %3154 = vpow2.f32 %v1513_v54  ;;  %v2988_v54 = vld [vmem:[%s3795_s1 + $0x64] sm:$0xf] }
 0x4e4   : > { %v1510_v55 = vpop.xlane.xlu0 %1509 }
 0x4e5   : > { %v1512_v57 = vsub.f32 %v1504_v50, %v1510_v55  ;;  %v2866_v50 = vld [vmem:[%s3795_s1 + $0x78] sm:$0xf0]  ;;  %v2857_v55 = vor.u32 %v2989_v53, %v2856_v52  ;;  %v3141_v52 = vld [vmem:[%s4229_s21] ss:$0 sm:$0xff]  ;;  %s4236_s21 = sld [smem:[#allocation44_spill]] (!%p2934_p1) }
 0x4e6   : > { %v2869_v51 = vor.u32 %v2990_v48, %v2866_v50 }
 0x4e7   : > { %v3155_v58 = vpop.eup %3154  ;;  %v1515_v59 = vmul.f32 1.442695, %v1512_v57  ;;  %v2858_v57 = vld [vmem:[%s3795_s1 + $0x68] sm:$0xf0]  ;;  %1839 = vmatpush.bf16.msra.mxu3 %v2857_v55 }
 0x4e8   : > { %v1517_v43 = vsel %vm1376_vm8, %v3155_v58, 0.0 }
 0x4e9   : > { %3156 = vpow2.f32 %v1515_v59  ;;  %1518 = vadd.xlane.f32.xlu1 %v1517_v43  ;;  %v2848_v59 = vld [vmem:[%s3795_s1 + $0x50] sm:$0xf]  ;;  %v2987_v43 = vld [vmem:[%s3795_s1 + $0x54] sm:$0xf0] }
 0x4ef   : > { %v3157_v60 = vpop.eup %3156 }
 0x4f0   : > { %v1520_v61 = vsel %vm1376_vm8, %v3157_v60, 0.0 }
 0x4f1   : > { %1521 = vadd.xlane.f32.xlu2 %v1520_v61  ;;  %v2849_v61 = vor.u32 %v2987_v43, %v2848_v59 }
 0x4f3   : > { %1840 = vmatpush.bf16.msra.mxu3 %v2849_v61  ;;  %v3006_v61 = vld [vmem:[%s3801_s30 + $0x70] sm:$0xff] }
 0x509   : > { %3129 = vrot.lane.b32.xlu2 %v3128_v30, %s3500_s3 }
 0x55c   : > { %v1519_v56 = vpop.xlane.xlu1 %1518 }
 0x55d   : > { %3158 = vrcp.f32 %v1519_v56  ;;  %v2850_v56 = vld [vmem:[%s3795_s1 + $0x58] sm:$0xf0] }
 0x563   : > { %v3159_v63 = vpop.eup %3158 }
 0x564   : > { %v1522_v62 = vpop.xlane.xlu2 %1521  ;;  %v1525_v4 = vmul.f32 %v3159_v63, %v3155_v58  ;;  %v2861_v58 = vor.u32 %v2988_v54, %v2858_v57  ;;  %v2840_v63 = vld [vmem:[%s3795_s1 + $0x40] sm:$0xf] }
 0x565   : > { %3160 = vrcp.f32 %v1522_v62 }
 0x566   : > { %3162 = vrcp.f32 %v3501_v33 }
 0x56b   : > { %v3161_v0 = vpop.eup %3160 }
 0x56c   : > { %v3130_v1 = vpop.permute.xlu2 %3129  ;;  %v1526_v5 = vmul.f32 %v3161_v0, %v3157_v60  ;;  %v3163_v34 = vpop.eup %3162  ;;  %v2986_v60 = vld [vmem:[%s3795_s1 + $0x54] sm:$0xf]  ;;  %v2985_v0 = vld [vmem:[%s3795_s1 + $0x44] sm:$0xf0] }
 0x56d   : > { %v3131_v2 = vunpack.i.l.bf16 %v3130_v1  ;;  %v3132_v3 = vunpack.i.h.bf16 %v3130_v1  ;;  %v1683_v35 = vmul.f32 128.0, %v3163_v34  ;;  %vm1687_vm9 = vweird.f32 %v3163_v34  ;;  %v2984_v1 = vld [vmem:[%s3795_s1 + $0x44] sm:$0xf] }
 0x56e   : > { %v2853_v62 = vor.u32 %v2986_v60, %v2850_v56  ;;  %v2999_v56 = vld [vmem:[%s3801_s30 + $0x38] sm:$0xff] }
 0x56f   : > { %1549 = vmatpush.msrb.mxu0 %v3131_v2  ;;  %1576 = vmatpush.msrb.mxu1 %v3132_v3  ;;  %v1684_v36 = vsub.f32 1.0, %v1683_v35  ;;  %v2841_v2 = vor.u32 %v2985_v0, %v2840_v63  ;;  %v2842_v3 = vld [vmem:[%s3795_s1 + $0x48] sm:$0xf0]  ;;  %v2998_v63 = vld [vmem:[%s3801_s30 + $0x30] sm:$0xff]  ;;  %v3004_v0 = vld [vmem:[%s3801_s30 + $0x60] sm:$0xff] }
 0x570   : > { %2772 = vmatmul.msk.f32.vlgmr.msrb.gmra.mxu0 %vm1376_vm8, %v1525_v4  ;;  %2773 = vmatmul.msk.f32.vlgmr.msrb.gmra.mxu1 %vm1376_vm8, %v1526_v5  ;;  %v2845_v4 = vor.u32 %v2984_v1, %v2842_v3  ;;  %v2832_v5 = vld [vmem:[%s3795_s1 + $0x30] sm:$0xf]  ;;  %v2997_v1 = vld [vmem:[%s3801_s30 + $0x28] sm:$0xff]  ;;  %v2996_v3 = vld [vmem:[%s3801_s30 + $0x20] sm:$0xff] }
 0x571   : > { %v1685_v32 = vmul.f32 %v3163_v34, %v1684_v36  ;;  %1852 = vmatpush.bf16.msra.mxu0 %v2869_v51  ;;  %1841 = vmatpush.bf16.msra.mxu3 %v2841_v2  ;;  %v2833_v8 = vor.u32 %v2983_v6, %v2832_v5  ;;  %v3003_v2 = vld [vmem:[%s3801_s30 + $0x58] sm:$0xff]  ;;  %v1752_v5 = vld [vmem:[%s3843_s4] sm:$0x3] }
 0x572   : > { %2036 = vmatpush.bf16.msra.mxu1 %v2999_v56  ;;  %v2995_v6 = vld [vmem:[%s3801_s30 + $0x18] sm:$0xff] }
 0x573   : > { %v1686_v37 = vadd.f32 %v3163_v34, %v1685_v32 }
 0x575   : > { %v4003_v38 = vsel %vm1687_vm9, %v3163_v34, %v1686_v37  ;;  %1853 = vmatpush.bf16.msra.mxu0 %v2861_v58  ;;  %1842 = vmatpush.bf16.msra.mxu3 %v2833_v8  ;;  %v1755_v8 = vperm.slane %v1752_v5, 1 }
 0x576   : > { %2037 = vmatpush.bf16.msra.mxu1 %v2998_v63  ;;  %v3143_v63 = vld [vmem:[%s1024_s29] ss:$0 sm:$0xff] }
 0x579   : > { %1854 = vmatpush.bf16.msra.mxu0 %v2853_v62  ;;  %v3005_v62 = vld [vmem:[%s3801_s30 + $0x68] sm:$0xff] }
 0x57a   : > { %2038 = vmatpush.bf16.msra.mxu1 %v2997_v1 }
 0x57d   : > { %1855 = vmatpush.bf16.msra.mxu0 %v2845_v4  ;;  %v3002_v4 = vld [vmem:[%s3801_s30 + $0x50] sm:$0xff] }
 0x57e   : > { %2039 = vmatpush.bf16.msra.mxu1 %v2996_v3 }
 0x581   : > { %1856 = vmatpush.bf16.msra.mxu0 %v2837_v10 }
 0x582   : > { %2040 = vmatpush.bf16.msra.mxu1 %v2995_v6 }
 0x586   : > { %2041 = vmatpush.bf16.msra.mxu1 %v2994_v9 }
 0x5ed   : > { %v1551_v13 = vpop.f32.mrf.mxu0  ;;  %v1578_v14 = vpop.f32.mrf.mxu1 }
 0x5ee   : > { %v3133_v15 = vpack.i.bf16 %v1578_v14, %v1551_v13  ;;  %v2980_v13 = vld [vmem:[%s3795_s1 + $0x24] sm:$0xf]  ;;  %v2825_v14 = vor.u32 %v2981_v12, %v2824_v11 }
 0x5ef   : > { %v3000_v11 = vld [vmem:[%s3801_s30 + $0x40] sm:$0xff] }
 0x5f0   : > { %3134 = vrot.lane.b32.xlu0 %v3133_v15, %s3500_s3  ;;  %v2826_v15 = vld [vmem:[%s3795_s1 + $0x28] sm:$0xf0]  ;;  %1843 = vmatpush.bf16.msra.mxu3 %v2825_v14 }
 0x5f1   : > { %v2829_v16 = vor.u32 %v2980_v13, %v2826_v15  ;;  %v2993_v13 = vld [vmem:[%s3801_s30 + $0x8] sm:$0xff]  ;;  %v1754_v15 = vperm.slane %v1752_v5, 0 }
 0x5f2   : > { %2042 = vmatpush.bf16.msra.mxu1 %v2993_v13 }
 0x5f3   : > { %1857 = vmatpush.bf16.msra.mxu0 %v2829_v16 }
 0x662   : > { %v3135_v17 = vpop.permute.xlu0 %3134 }
 0x663   : > { %v3137_v18 = vunpack.i.h.bf16 %v3135_v17  ;;  %v3136_v19 = vunpack.i.l.bf16 %v3135_v17  ;;  %v2816_v17 = vld [vmem:[%s3795_s1 + $0x10] sm:$0xf] }
 0x665   : > { %v1589_v20 = vsel %vm1313_vm7, %v3970_v41, %v3136_v19  ;;  %v1590_v21 = vsel %vm1313_vm7, %v3972_v42, %v3137_v18  ;;  %v2979_v18 = vld [vmem:[%s3795_s1 + $0x14] sm:$0xf0]  ;;  %v2978_v19 = vld [vmem:[%s3795_s1 + $0x14] sm:$0xf] }
 0x666   : > { %v1591_v22 = vpack.c.bf16 %v1590_v21, %v1589_v20  ;;  %v2817_v20 = vor.u32 %v2979_v18, %v2816_v17  ;;  %v2818_v21 = vld [vmem:[%s3795_s1 + $0x18] sm:$0xf0]  ;;  %v2992_v18 = vld [vmem:[%s3801_s30] sm:$0xff] }
 0x667   : > { %2043 = vmatpush.bf16.msra.mxu1 %v2992_v18 }
 0x668   : > { %1668 = vmatmul.bf16.vlgmr.msrb.gmra.mxu2 %v1591_v22  ;;  %v2808_v22 = vld [vmem:[%s3795_s1] sm:$0xf]  ;;  %1844 = vmatpush.bf16.msra.mxu3 %v2817_v20 }
 0x6eb   : > { %v1669_v24 = vpop.f32.mrf.mxu2 }
 0x6ec   : > { %v1670_v25 = vadd.f32 %v3140_v23, %v1669_v24 }
 0x6ee   : > { %v1674_v26 = vadd.f32 %v1670_v25, %v3903_v28  ;;  %v2821_v25 = vor.u32 %v2978_v19, %v2818_v21 }
 0x6f0   : > { %1678 = vadd.xlane.f32.xlu1 %v1674_v26  ;;  %1858 = vmatpush.bf16.msra.mxu0 %v2821_v25 }
 0x6f3   : > { %v1671_v27 = vpop.f32.mrf.mxu2 }
 0x6f4   : > { %v1672_v30 = vadd.f32 %v3140_v23, %v1671_v27  ;;  %v2977_v23 = vld [vmem:[%s3795_s1 + $0x4] sm:$0xf0]  ;;  %v2810_v27 = vld [vmem:[%s3795_s1 + $0x8] sm:$0xf0] }
 0x6f6   : > { %v1675_v31 = vadd.f32 %v1672_v30, %v3905_v29 }
 0x6f8   : > { %1680 = vadd.xlane.f32.xlu2 %v1675_v31 }
 0x763   : > { %v1679_v28 = vpop.xlane.xlu1 %1678 }
 0x764   : > { %v1689_v39 = vmul.f32 %v4003_v38, %v1679_v28 }
 0x766   : > { %v4006_v40 = vsub.f32 %v1674_v26, %v1689_v39  ;;  %v2976_v26 = vld [vmem:[%s3795_s1 + $0x4] sm:$0xf]  ;;  %s4235_s1 = sld [smem:[#allocation43_spill]] (!%p2934_p1) }
 0x767   : > { %v2813_v33 = vor.u32 %v2976_v26, %v2810_v27 }
 0x768   : > { %v1693_v29 = vmul.f32 %v4006_v40, %v4006_v40 }
 0x769   : > { %1859 = vmatpush.bf16.msra.mxu0 %v2813_v33 }
 0x76a   : > { %1695 = vadd.xlane.f32.xlu1 %v1693_v29 }
 0x76b   : > { %v1681_v41 = vpop.xlane.xlu2 %1680 }
 0x76c   : > { %v1690_v42 = vmul.f32 %v4003_v38, %v1681_v41 }
 0x76e   : > { %v4011_v44 = vsub.f32 %v1675_v31, %v1690_v42  ;;  %v2809_v31 = vor.u32 %v2977_v23, %v2808_v22 }
 0x770   : > { %v1694_v45 = vmul.f32 %v4011_v44, %v4011_v44  ;;  %1845 = vmatpush.bf16.msra.mxu3 %v2809_v31 }
 0x772   : > { %1697 = vadd.xlane.f32.xlu0 %v1694_v45 }
 0x7dd   : > { %v1696_v24 = vpop.xlane.xlu1 %1695 }
 0x7de   : > { %v1699_v30 = vmul.f32 %v1696_v24, %v4003_v38 }
 0x7e0   : > { %v1701_v34 = vadd.f32 1e-12, %v1699_v30 }
 0x7e2   : > { %3164 = vrsqrt.f32 %v1701_v34  ;;  %vm1709_vm11 = vweird.f32 %v1701_v34 }
 0x7e5   : > { %v1698_v35 = vpop.xlane.xlu0 %1697 }
 0x7e6   : > { %v1700_v36 = vmul.f32 %v1698_v35, %v4003_v38 }
 0x7e8   : > { %v3165_v32 = vpop.eup %3164  ;;  %v1702_v37 = vadd.f32 1e-12, %v1700_v36 }
 0x7e9   : > { %v1704_v28 = vmul.f32 %v3165_v32, %v1701_v34  ;;  %vm1710_vm10 = vweird.f32 %v3165_v32 }
 0x7ea   : > { %3166 = vrsqrt.f32 %v1702_v37  ;;  %vm1711_vm12 = vmor %vm1709_vm11, %vm1710_vm10  ;;  %vm1719_vm14 = vweird.f32 %v1702_v37 }
 0x7eb   : > { %v1705_v39 = vmul.f32 %v3165_v32, %v1704_v28 }
 0x7ed   : > { %v1706_v29 = vmul.f32 0.5, %v1705_v39 }
 0x7ef   : > { %v1707_v41 = vsub.f32 1.5, %v1706_v29 }
 0x7f0   : > { %v3167_v42 = vpop.eup %3166 }
 0x7f1   : > { %v1708_v45 = vmul.f32 %v3165_v32, %v1707_v41  ;;  %v1714_v46 = vmul.f32 %v3167_v42, %v1702_v37  ;;  %vm1720_vm13 = vweird.f32 %v3167_v42 }
 0x7f2   : > { %vm1721_vm15 = vmor %vm1719_vm14, %vm1720_vm13 }
 0x7f3   : > { %v1715_v47 = vmul.f32 %v3167_v42, %v1714_v46  ;;  %v1712_v48 = vsel %vm1711_vm12, %v3165_v32, %v1708_v45 }
 0x7f4   : > { %v1723_v51 = vmul.f32 %v1712_v48, %v4006_v40  ;;  %v3142_v40 = vld [vmem:[%s1017_s12] ss:$0 sm:$0xff] }
 0x7f5   : > { %v1716_v49 = vmul.f32 0.5, %v1715_v47 }
 0x7f6   : > { %v1728_v57 = vmul.f32 %v3141_v52, %v1723_v51 }
 0x7f7   : > { %v1717_v50 = vsub.f32 1.5, %v1716_v49 }
 0x7f8   : > { %v4061_v59 = vadd.f32 %v3142_v40, %v1728_v57 }
 0x7f9   : > { %v1718_v53 = vmul.f32 %v3167_v42, %v1717_v50 }
 0x7fb   : > { %v1722_v54 = vsel %vm1721_vm15, %v3167_v42, %v1718_v53 }
 0x7fc   : > { %v1724_v55 = vmul.f32 %v1722_v54, %v4011_v44  ;;  %v3007_v44 = vld [vmem:[%s3801_s30 + $0x78] sm:$0xff] }
 0x7fd   : > { %2050 = vmatpush.bf16.msra.mxu2 %v3007_v44 }
 0x7fe   : > { %v1729_v58 = vmul.f32 %v3141_v52, %v1724_v55 }
 0x800   : > { %v4063_v43 = vadd.f32 %v3142_v40, %v1729_v58 }
 0x801   : > { %2051 = vmatpush.bf16.msra.mxu2 %v3006_v61 }
 0x802   : > { %v1735_v60 = vpack.c.bf16 %v4063_v43, %v4061_v59 }
 0x804   : > { %1846 = vmatmul.bf16.vlgmr.msra.gmra.mxu3 %v1735_v60  ;;  %1860 = vmatmul.bf16.vlgmr.msra.gmra.mxu0 %v1735_v60 }
 0x805   : > { %2052 = vmatpush.bf16.msra.mxu2 %v3005_v62 }
 0x809   : > { %2053 = vmatpush.bf16.msra.mxu2 %v3004_v0 }
 0x80d   : > { %2054 = vmatpush.bf16.msra.mxu2 %v3003_v2 }
 0x811   : > { %2055 = vmatpush.bf16.msra.mxu2 %v3002_v4 }
 0x815   : > { %2056 = vmatpush.bf16.msra.mxu2 %v3001_v7 }
 0x819   : > { %2057 = vmatpush.bf16.msra.mxu2 %v3000_v11 }
 0x881   : > { %v1861_v10 = vpop.f32.mrf.mxu0 }
 0x882   : > { %v1862_v12 = vadd.f32 %v1861_v10, %v1755_v8 }
 0x884   : > { %v1867_v14 = vmul.f32 %v1862_v12, %v1862_v12 }
 0x886   : > { %v1871_v16 = vmul.f32 %v1867_v14, %v1862_v12 }
 0x887   : > { %v1847_v17 = vpop.f32.mrf.mxu3 }
 0x888   : > { %v1875_v19 = vmul.f32 0.044715, %v1871_v16  ;;  %v1848_v20 = vadd.f32 %v1847_v17, %v1754_v15 }
 0x889   : > { %v1863_v21 = vpop.f32.mrf.mxu0 }
 0x88a   : > { %v1879_v22 = vadd.f32 %v1875_v19, %v1862_v12  ;;  %v1866_v23 = vmul.f32 %v1848_v20, %v1848_v20  ;;  %v1864_v24 = vadd.f32 %v1863_v21, %v1755_v8 }
 0x88c   : > { %v1883_v25 = vmul.f32 0.7978846, %v1879_v22  ;;  %v1870_v26 = vmul.f32 %v1866_v23, %v1848_v20  ;;  %v1869_v27 = vmul.f32 %v1864_v24, %v1864_v24 }
 0x88e   : > { %v1874_v30 = vmul.f32 0.044715, %v1870_v26  ;;  %v1873_v31 = vmul.f32 %v1869_v27, %v1864_v24  ;;  %3168 = vtanh.f32 %v1883_v25 }
 0x88f   : > { %v1849_v33 = vpop.f32.mrf.mxu3 }
 0x890   : > { %v1878_v34 = vadd.f32 %v1874_v30, %v1848_v20  ;;  %v1877_v35 = vmul.f32 0.044715, %v1873_v31  ;;  %v1850_v36 = vadd.f32 %v1849_v33, %v1754_v15  ;;  %v3144_v33 = vld [vmem:[%s1027_s0] ss:$0 sm:$0xff] }
 0x892   : > { %v1882_v32 = vmul.f32 0.7978846, %v1878_v34  ;;  %v1881_v37 = vadd.f32 %v1877_v35, %v1864_v24  ;;  %v1868_v28 = vmul.f32 %v1850_v36, %v1850_v36  ;;  %v3145_v35 = vld [vmem:[%s1030_s8] ss:$0 sm:$0xff]  ;;  %s4233_s8 = sld [smem:[#allocation39_spill]] (!%p2934_p1) }
 0x894   : > { %v1885_v39 = vmul.f32 0.7978846, %v1881_v37  ;;  %v1872_v29 = vmul.f32 %v1868_v28, %v1850_v36  ;;  %3170 = vtanh.f32 %v1882_v32  ;;  %v3169_v41 = vpop.eup %3168 }
 0x895   : > { %v1891_v46 = vadd.f32 1.0, %v3169_v41 }
 0x896   : > { %3172 = vtanh.f32 %v1885_v39  ;;  %v1876_v42 = vmul.f32 0.044715, %v1872_v29 }
 0x897   : > { %v1895_v50 = vmul.f32 0.5, %v1891_v46 }
 0x898   : > { %v1880_v45 = vadd.f32 %v1876_v42, %v1850_v36 }
 0x899   : > { %v1899_v54 = vmul.f32 %v1895_v50, %v1862_v12 }
 0x89a   : > { %v1884_v47 = vmul.f32 0.7978846, %v1880_v45  ;;  %v3171_v48 = vpop.eup %3170 }
 0x89b   : > { %v1890_v52 = vadd.f32 1.0, %v3171_v48 }
 0x89c   : > { %v3173_v49 = vpop.eup %3172  ;;  %3174 = vtanh.f32 %v1884_v47 }
 0x89d   : > { %v1893_v51 = vadd.f32 1.0, %v3173_v49  ;;  %v1894_v40 = vmul.f32 0.5, %v1890_v52 }
 0x89f   : > { %v1897_v53 = vmul.f32 0.5, %v1893_v51  ;;  %v1898_v61 = vmul.f32 %v1894_v40, %v1848_v20 }
 0x8a1   : > { %v1901_v55 = vmul.f32 %v1897_v53, %v1864_v24 }
 0x8a2   : > { %v3175_v57 = vpop.eup %3174 }
 0x8a3   : > { %v1892_v58 = vadd.f32 1.0, %v3175_v57  ;;  %v1903_v60 = vpack.c.bf16 %v1901_v55, %v1899_v54 }
 0x8a5   : > { %v1896_v44 = vmul.f32 0.5, %v1892_v58  ;;  %2058 = vmatmul.bf16.vlgmr.msra.gmra.mxu2 %v1903_v60 }
 0x8a7   : > { %v1900_v56 = vmul.f32 %v1896_v44, %v1850_v36 }
 0x8a9   : > { %v1902_v62 = vpack.c.bf16 %v1900_v56, %v1898_v61 }
 0x8ab   : > { %2044 = vmatmul.bf16.vlgmr.msra.gmra.mxu1 %v1902_v62 }
 0x928   : > { %v2045_v0 = vpop.f32.mrf.mxu1  ;;  %v2059_v1 = vpop.f32.mrf.mxu2 }
 0x929   : > { %v2046_v2 = vadd.f32 %v3143_v63, %v2045_v0 }
 0x92b   : > { %v2060_v3 = vadd.f32 %v2059_v1, %v2046_v2 }
 0x92d   : > { %v2064_v4 = vadd.f32 %v2060_v3, %v4061_v59 }
 0x92f   : > { %2068 = vadd.xlane.f32.xlu1 %v2064_v4 }
 0x930   : > { %v2047_v5 = vpop.f32.mrf.mxu1  ;;  %v2061_v7 = vpop.f32.mrf.mxu2 }
 0x931   : > { %v2048_v6 = vadd.f32 %v3143_v63, %v2047_v5 }
 0x933   : > { %v2062_v8 = vadd.f32 %v2061_v7, %v2048_v6 }
 0x935   : > { %v2065_v9 = vadd.f32 %v2062_v8, %v4063_v43 }
 0x937   : > { %2070 = vadd.xlane.f32.xlu1 %v2065_v9 }
 0x9a2   : > { %v2069_v10 = vpop.xlane.xlu1 %2068 }
 0x9a3   : > { %v2072_v11 = vmul.f32 %v2069_v10, %v4003_v38 }
 0x9a5   : > { %v2074_v12 = vsub.f32 %v2064_v4, %v2072_v11 }
 0x9a7   : > { %v2076_v13 = vmul.f32 %v2074_v12, %v2074_v12 }
 0x9a9   : > { %2078 = vadd.xlane.f32.xlu1 %v2076_v13 }
 0x9aa   : > { %v2071_v14 = vpop.xlane.xlu1 %2070 }
 0x9ab   : > { %v2073_v15 = vmul.f32 %v2071_v14, %v4003_v38 }
 0x9ad   : > { %v2075_v16 = vsub.f32 %v2065_v9, %v2073_v15 }
 0x9af   : > { %v2077_v17 = vmul.f32 %v2075_v16, %v2075_v16 }
 0x9b1   : > { %2080 = vadd.xlane.f32.xlu1 %v2077_v17 }
 0xa1c   : > { %v2079_v59 = vpop.xlane.xlu1 %2078 }
 0xa1d   : > { %v2082_v18 = vmul.f32 %v2079_v59, %v4003_v38 }
 0xa1f   : > { %v2084_v19 = vadd.f32 1e-12, %v2082_v18 }
 0xa21   : > { %3176 = vrsqrt.f32 %v2084_v19  ;;  %vm2092_vm1 = vweird.f32 %v2084_v19 }
 0xa24   : > { %v2081_v43 = vpop.xlane.xlu1 %2080 }
 0xa25   : > { %v2083_v20 = vmul.f32 %v2081_v43, %v4003_v38 }
 0xa27   : > { %v3177_v21 = vpop.eup %3176  ;;  %v2085_v22 = vadd.f32 1e-12, %v2083_v20 }
 0xa28   : > { %v2087_v23 = vmul.f32 %v3177_v21, %v2084_v19  ;;  %vm2093_vm0 = vweird.f32 %v3177_v21 }
 0xa29   : > { %3178 = vrsqrt.f32 %v2085_v22  ;;  %vm2094_vm2 = vmor %vm2092_vm1, %vm2093_vm0  ;;  %vm2102_vm4 = vweird.f32 %v2085_v22 }
 0xa2a   : > { %v2088_v24 = vmul.f32 %v3177_v21, %v2087_v23 }
 0xa2c   : > { %v2089_v25 = vmul.f32 0.5, %v2088_v24 }
 0xa2e   : > { %v2090_v26 = vsub.f32 1.5, %v2089_v25 }
 0xa2f   : > { %v3179_v27 = vpop.eup %3178 }
 0xa30   : > { %v2091_v30 = vmul.f32 %v3177_v21, %v2090_v26  ;;  %v2097_v31 = vmul.f32 %v3179_v27, %v2085_v22  ;;  %vm2103_vm3 = vweird.f32 %v3179_v27 }
 0xa31   : > { %vm2104_vm5 = vmor %vm2102_vm4, %vm2103_vm3 }
 0xa32   : > { %v2095_v38 = vsel %vm2094_vm2, %v3177_v21, %v2091_v30  ;;  %v2098_v34 = vmul.f32 %v3179_v27, %v2097_v31 }
 0xa33   : > { %v2106_v36 = vmul.f32 %v2095_v38, %v2074_v12 }
 0xa34   : > { %v2099_v32 = vmul.f32 0.5, %v2098_v34 }
 0xa35   : > { %v2111_v37 = vmul.f32 %v3144_v33, %v2106_v36 }
 0xa36   : > { %v2100_v28 = vsub.f32 1.5, %v2099_v32 }
 0xa37   : > { %v4105_v39 = vadd.f32 %v3145_v35, %v2111_v37 }
 0xa38   : > { %v2101_v29 = vmul.f32 %v3179_v27, %v2100_v28 }
 0xa39   : > { %2118 = vst [vmem:[#allocation2] sm:$0xff] %v4105_v39 }
 0xa3a   : > { %v2105_v41 = vsel %vm2104_vm5, %v3179_v27, %v2101_v29 }
 0xa3b   : > { %v2107_v42 = vmul.f32 %v2105_v41, %v2075_v16 }
 0xa3d   : > { %v2112_v45 = vmul.f32 %v3144_v33, %v2107_v42  ;;  %2123 = sbr.rel (%p2934_p1) target bundleno = 3219 (0xc93), region = 152 }
 0xa3f   : > { %v4108_v46 = vadd.f32 %v3145_v35, %v2112_v45 }
 0xa41   : > { %2119 = vst [vmem:[#allocation2 + $0x8] sm:$0xff] %v4108_v46 }
 0xa42   : > { %v2139_v47 = vld [vmem:[#allocation9 + $0x78] sm:$0xff]  ;;  %v2138_v48 = vld [vmem:[#allocation9 + $0x70] sm:$0xff]  ;;  %v2137_v49 = vld [vmem:[#allocation9 + $0x68] sm:$0xff]  ;;  %v2146_v27 = vrot.slane %v4108_v46, 7  ;;  %vm2147_vm6 = vcmask 1041409  }
 0xa43   : > { %2150 = vmatpush.msra.mxu0 %v2139_v47  ;;  %v2136_v50 = vld [vmem:[#allocation9 + $0x60] sm:$0xff]  ;;  %v2135_v51 = vld [vmem:[#allocation9 + $0x58] sm:$0xff]  ;;  %v2217_v53 = vld [vmem:[#allocation11 + $0x1f0] sm:$0xff] }
 0xa44   : > { %v2216_v52 = vld [vmem:[#allocation11 + $0x1e0] sm:$0xff]  ;;  %2247 = vmatpush.msra.mxu2 %v2217_v53  ;;  %v2218_v54 = vld [vmem:[#allocation11 + $0x1f8] sm:$0xff]  ;;  %v2214_v57 = vld [vmem:[#allocation11 + $0x1d0] sm:$0xff]  ;;  %v2148_v33 = vsel %vm2147_vm6, %v2146_v27, %v4105_v39 }
 0xa45   : > { %2151 = vmatpush.msra.mxu0 %v2138_v48  ;;  %2227 = vmatpush.msra.mxu1 %v2216_v52  ;;  %v2213_v55 = vld [vmem:[#allocation11 + $0x1c0] sm:$0xff]  ;;  %v2215_v40 = vld [vmem:[#allocation11 + $0x1d8] sm:$0xff]  ;;  %v2211_v60 = vld [vmem:[#allocation11 + $0x1b0] sm:$0xff] }
 0xa46   : > { %2267 = vmatpush.msra.mxu3 %v2218_v54  ;;  %v2210_v58 = vld [vmem:[#allocation11 + $0x1a0] sm:$0xff]  ;;  %v2134_v44 = vld [vmem:[#allocation9 + $0x50] sm:$0xff]  ;;  %2248 = vmatpush.msra.mxu2 %v2214_v57  ;;  %v2212_v61 = vld [vmem:[#allocation11 + $0x1b8] sm:$0xff] }
 0xa47   : > { %2152 = vmatpush.msra.mxu0 %v2137_v49  ;;  %2228 = vmatpush.msra.mxu1 %v2213_v55  ;;  %v2207_v56 = vld [vmem:[#allocation11 + $0x180] sm:$0xff]  ;;  %v2208_v62 = vld [vmem:[#allocation11 + $0x190] sm:$0xff]  ;;  %v2133_v63 = vld [vmem:[#allocation9 + $0x48] sm:$0xff] }
 0xa48   : > { %2268 = vmatpush.msra.mxu3 %v2215_v40  ;;  %2249 = vmatpush.msra.mxu2 %v2211_v60  ;;  %v2209_v0 = vld [vmem:[#allocation11 + $0x198] sm:$0xff]  ;;  %v2204_v1 = vld [vmem:[#allocation11 + $0x160] sm:$0xff]  ;;  %v2205_v2 = vld [vmem:[#allocation11 + $0x170] sm:$0xff] }
 0xa49   : > { %2153 = vmatpush.msra.mxu0 %v2136_v50  ;;  %2229 = vmatpush.msra.mxu1 %v2210_v58  ;;  %v2132_v3 = vld [vmem:[#allocation9 + $0x40] sm:$0xff]  ;;  %v2206_v4 = vld [vmem:[#allocation11 + $0x178] sm:$0xff]  ;;  %v2202_v6 = vld [vmem:[#allocation11 + $0x150] sm:$0xff] }
 0xa4a   : > { %2269 = vmatpush.msra.mxu3 %v2212_v61  ;;  %2250 = vmatpush.msra.mxu2 %v2208_v62  ;;  %v2201_v5 = vld [vmem:[#allocation11 + $0x140] sm:$0xff]  ;;  %v2131_v7 = vld [vmem:[#allocation9 + $0x38] sm:$0xff]  ;;  %v2130_v9 = vld [vmem:[#allocation9 + $0x30] sm:$0xff] }
 0xa4b   : > { %2154 = vmatpush.msra.mxu0 %v2135_v51  ;;  %2230 = vmatpush.msra.mxu1 %v2207_v56  ;;  %v2203_v8 = vld [vmem:[#allocation11 + $0x158] sm:$0xff]  ;;  %v2198_v10 = vld [vmem:[#allocation11 + $0x120] sm:$0xff]  ;;  %v2199_v11 = vld [vmem:[#allocation11 + $0x130] sm:$0xff] }
 0xa4c   : > { %2270 = vmatpush.msra.mxu3 %v2209_v0  ;;  %2251 = vmatpush.msra.mxu2 %v2205_v2  ;;  %v2200_v12 = vld [vmem:[#allocation11 + $0x138] sm:$0xff]  ;;  %v2195_v13 = vld [vmem:[#allocation11 + $0x100] sm:$0xff]  ;;  %v2196_v14 = vld [vmem:[#allocation11 + $0x110] sm:$0xff] }
 0xa4d   : > { %2155 = vmatpush.msra.mxu0 %v2134_v44  ;;  %2231 = vmatpush.msra.mxu1 %v2204_v1  ;;  %v2129_v15 = vld [vmem:[#allocation9 + $0x28] sm:$0xff]  ;;  %v2197_v16 = vld [vmem:[#allocation11 + $0x118] sm:$0xff]  ;;  %v2192_v17 = vld [vmem:[#allocation11 + $0xe0] sm:$0xff] }
 0xa4e   : > { %2271 = vmatpush.msra.mxu3 %v2206_v4  ;;  %2252 = vmatpush.msra.mxu2 %v2202_v6  ;;  %v2193_v59 = vld [vmem:[#allocation11 + $0xf0] sm:$0xff]  ;;  %v2128_v18 = vld [vmem:[#allocation9 + $0x20] sm:$0xff]  ;;  %v2194_v19 = vld [vmem:[#allocation11 + $0xf8] sm:$0xff] }
 0xa4f   : > { %2156 = vmatpush.msra.mxu0 %v2133_v63  ;;  %2232 = vmatpush.msra.mxu1 %v2201_v5  ;;  %v2189_v43 = vld [vmem:[#allocation11 + $0xc0] sm:$0xff]  ;;  %v2190_v20 = vld [vmem:[#allocation11 + $0xd0] sm:$0xff]  ;;  %v2127_v21 = vld [vmem:[#allocation9 + $0x18] sm:$0xff] }
 0xa50   : > { %2272 = vmatpush.msra.mxu3 %v2203_v8  ;;  %2253 = vmatpush.msra.mxu2 %v2199_v11  ;;  %v2191_v22 = vld [vmem:[#allocation11 + $0xd8] sm:$0xff]  ;;  %v2186_v23 = vld [vmem:[#allocation11 + $0xa0] sm:$0xff]  ;;  %v2187_v24 = vld [vmem:[#allocation11 + $0xb0] sm:$0xff] }
 0xa51   : > { %2157 = vmatpush.msra.mxu0 %v2132_v3  ;;  %2233 = vmatpush.msra.mxu1 %v2198_v10  ;;  %v2126_v25 = vld [vmem:[#allocation9 + $0x10] sm:$0xff]  ;;  %v2188_v26 = vld [vmem:[#allocation11 + $0xb8] sm:$0xff]  ;;  %v2125_v30 = vld [vmem:[#allocation9 + $0x8] sm:$0xff] }
 0xa52   : > { %2273 = vmatpush.msra.mxu3 %v2200_v12  ;;  %2254 = vmatpush.msra.mxu2 %v2196_v14  ;;  %v2124_v31 = vld [vmem:[#allocation9] sm:$0xff]  ;;  %v2184_v34 = vld [vmem:[#allocation11 + $0x90] sm:$0xff]  ;;  %v2185_v35 = vld [vmem:[#allocation11 + $0x98] sm:$0xff] }
 0xa53   : > { %2158 = vmatpush.msra.mxu0 %v2131_v7  ;;  %2234 = vmatpush.msra.mxu1 %v2195_v13  ;;  %v2183_v38 = vld [vmem:[#allocation11 + $0x80] sm:$0xff]  ;;  %v2181_v32 = vld [vmem:[#allocation11 + $0x70] sm:$0xff]  ;;  %v2182_v37 = vld [vmem:[#allocation11 + $0x78] sm:$0xff] }
 0xa54   : > { %2274 = vmatpush.msra.mxu3 %v2197_v16  ;;  %2255 = vmatpush.msra.mxu2 %v2193_v59  ;;  %v2180_v36 = vld [vmem:[#allocation11 + $0x60] sm:$0xff]  ;;  %v2178_v29 = vld [vmem:[#allocation11 + $0x50] sm:$0xff]  ;;  %v2179_v41 = vld [vmem:[#allocation11 + $0x58] sm:$0xff] }
 0xa55   : > { %2159 = vmatpush.msra.mxu0 %v2130_v9  ;;  %2235 = vmatpush.msra.mxu1 %v2192_v17  ;;  %v2177_v28 = vld [vmem:[#allocation11 + $0x40] sm:$0xff]  ;;  %v2175_v45 = vld [vmem:[#allocation11 + $0x30] sm:$0xff]  ;;  %v2176_v39 = vld [vmem:[#allocation11 + $0x38] sm:$0xff] }
 0xa56   : > { %2275 = vmatpush.msra.mxu3 %v2194_v19  ;;  %2256 = vmatpush.msra.mxu2 %v2190_v20  ;;  %v2174_v42 = vld [vmem:[#allocation11 + $0x20] sm:$0xff]  ;;  %v2172_v47 = vld [vmem:[#allocation11 + $0x10] sm:$0xff]  ;;  %v2173_v48 = vld [vmem:[#allocation11 + $0x18] sm:$0xff] }
 0xa57   : > { %2160 = vmatpush.msra.mxu0 %v2129_v15  ;;  %2236 = vmatpush.msra.mxu1 %v2189_v43  ;;  %v2171_v46 = vld [vmem:[#allocation11] sm:$0xff]  ;;  %v3180_v49 = vld [vmem:[%s4233_s8] ss:$0 sm:$0xff]  ;;  %v2344_v53 = vld [vmem:[#allocation12 + $0x78] sm:$0xff] }
 0xa58   : > { %2276 = vmatpush.msra.mxu3 %v2191_v22  ;;  %2257 = vmatpush.msra.mxu2 %v2187_v24  ;;  %v2343_v54 = vld [vmem:[#allocation12 + $0x70] sm:$0xff]  ;;  %v2342_v55 = vld [vmem:[#allocation12 + $0x68] sm:$0xff]  ;;  %v2341_v57 = vld [vmem:[#allocation12 + $0x60] sm:$0xff] }
 0xa59   : > { %2161 = vmatpush.msra.mxu0 %v2128_v18  ;;  %2237 = vmatpush.msra.mxu1 %v2186_v23  ;;  %v2340_v40 = vld [vmem:[#allocation12 + $0x58] sm:$0xff]  ;;  %v2339_v58 = vld [vmem:[#allocation12 + $0x50] sm:$0xff]  ;;  %v2338_v60 = vld [vmem:[#allocation12 + $0x48] sm:$0xff] }
 0xa5a   : > { %2277 = vmatpush.msra.mxu3 %v2188_v26  ;;  %2258 = vmatpush.msra.mxu2 %v2184_v34  ;;  %v2337_v44 = vld [vmem:[#allocation12 + $0x40] sm:$0xff]  ;;  %v2219_v61 = vld [vmem:[%s4234_s25] sm:$0xf]  ;;  %v2336_v56 = vld [vmem:[#allocation12 + $0x38] sm:$0xff] }
 0xa5b   : > { %2162 = vmatpush.msra.mxu0 %v2127_v21  ;;  %2238 = vmatpush.msra.mxu1 %v2183_v38  ;;  %v2221_v62 = vperm.slane %v2219_v61, 0  ;;  %v2335_v63 = vld [vmem:[#allocation12 + $0x30] sm:$0xff]  ;;  %v2334_v0 = vld [vmem:[#allocation12 + $0x28] sm:$0xff]  ;;  %v2333_v3 = vld [vmem:[#allocation12 + $0x20] sm:$0xff]  ;;  %v2223_v7 = vperm.slane %v2219_v61, 3  ;;  %v2222_v18 = vperm.slane %v2219_v61, 2 }
 0xa5c   : > { %2278 = vmatpush.msra.mxu3 %v2185_v35  ;;  %2259 = vmatpush.msra.mxu2 %v2181_v32  ;;  %v2332_v4 = vld [vmem:[#allocation12 + $0x18] sm:$0xff]  ;;  %v2331_v6 = vld [vmem:[#allocation12 + $0x10] sm:$0xff]  ;;  %v2330_v8 = vld [vmem:[#allocation12 + $0x8] sm:$0xff] }
 0xa5d   : > { %2163 = vmatpush.msra.mxu0 %v2126_v25  ;;  %2239 = vmatpush.msra.mxu1 %v2180_v36  ;;  %v2329_v10 = vld [vmem:[#allocation12] sm:$0xff]  ;;  %v2385_v13 = vld [vmem:[#allocation14 + $0x78] sm:$0xff]  ;;  %v2384_v14 = vld [vmem:[#allocation14 + $0x70] sm:$0xff] }
 0xa5e   : > { %2279 = vmatpush.msra.mxu3 %v2182_v37  ;;  %2260 = vmatpush.msra.mxu2 %v2178_v29  ;;  %v2383_v17 = vld [vmem:[#allocation14 + $0x68] sm:$0xff]  ;;  %v2382_v59 = vld [vmem:[#allocation14 + $0x60] sm:$0xff]  ;;  %v2381_v19 = vld [vmem:[#allocation14 + $0x58] sm:$0xff] }
 0xa5f   : > { %2164 = vmatpush.msra.mxu0 %v2125_v30  ;;  %2240 = vmatpush.msra.mxu1 %v2177_v28  ;;  %v2380_v21 = vld [vmem:[#allocation14 + $0x50] sm:$0xff]  ;;  %v2379_v25 = vld [vmem:[#allocation14 + $0x48] sm:$0xff]  ;;  %v2378_v27 = vld [vmem:[#allocation14 + $0x40] sm:$0xff] }
 0xa60   : > { %2280 = vmatpush.msra.mxu3 %v2179_v41  ;;  %2261 = vmatpush.msra.mxu2 %v2175_v45  ;;  %v2376_v35 = vld [vmem:[#allocation14 + $0x30] sm:$0xff]  ;;  %v2375_v29 = vld [vmem:[#allocation14 + $0x28] sm:$0xff] }
 0xa61   : > { %2165 = vmatpush.msra.mxu0 %v2124_v31  ;;  %2241 = vmatpush.msra.mxu1 %v2174_v42  ;;  %v3181_v61 = vld [vmem:[%s4235_s1] ss:$0 sm:$0xff] }
 0xa62   : > { %2166 = vmatmul.f32.vlgmr.msra.gmra.mxu0 %v2148_v33  ;;  %2281 = vmatpush.msra.mxu3 %v2176_v39  ;;  %v2377_v33 = vld [vmem:[#allocation14 + $0x38] sm:$0xff] }
 0xa63   : > { %2242 = vmatpush.msra.mxu1 %v2171_v46  ;;  %2262 = vmatpush.msra.mxu2 %v2172_v47  ;;  %v2374_v46 = vld [vmem:[#allocation14 + $0x20] sm:$0xff] }
 0xa64   : > { %2282 = vmatpush.msra.mxu3 %v2173_v48  ;;  %2349 = vmatpush.msrb.mxu0 %v2344_v53 }
 0xa65   : > { %2390 = vmatpush.msrb.mxu1 %v2385_v13 }
 0xa66   : > { %2350 = vmatpush.msrb.mxu0 %v2343_v54 }
 0xa67   : > { %2391 = vmatpush.msrb.mxu1 %v2384_v14 }
 0xa68   : > { %2351 = vmatpush.msrb.mxu0 %v2342_v55 }
 0xa69   : > { %2392 = vmatpush.msrb.mxu1 %v2383_v17 }
 0xa6a   : > { %2352 = vmatpush.msrb.mxu0 %v2341_v57 }
 0xa6b   : > { %2393 = vmatpush.msrb.mxu1 %v2382_v59 }
 0xa6c   : > { %2353 = vmatpush.msrb.mxu0 %v2340_v40 }
 0xa6d   : > { %2394 = vmatpush.msrb.mxu1 %v2381_v19 }
 0xa6e   : > { %2354 = vmatpush.msrb.mxu0 %v2339_v58  ;;  %v2372_v58 = vld [vmem:[#allocation14 + $0x10] sm:$0xff] }
 0xa6f   : > { %2395 = vmatpush.msrb.mxu1 %v2380_v21 }
 0xa70   : > { %2355 = vmatpush.msrb.mxu0 %v2338_v60  ;;  %v2371_v60 = vld [vmem:[#allocation14 + $0x8] sm:$0xff] }
 0xa71   : > { %2396 = vmatpush.msrb.mxu1 %v2379_v25 }
 0xa72   : > { %2356 = vmatpush.msrb.mxu0 %v2337_v44  ;;  %v2370_v44 = vld [vmem:[#allocation14] sm:$0xff] }
 0xa73   : > { %2397 = vmatpush.msrb.mxu1 %v2378_v27 }
 0xa74   : > { %2357 = vmatpush.msrb.mxu0 %v2336_v56 }
 0xa75   : > { %2398 = vmatpush.msrb.mxu1 %v2377_v33 }
 0xa76   : > { %2358 = vmatpush.msrb.mxu0 %v2335_v63 }
 0xa77   : > { %2399 = vmatpush.msrb.mxu1 %v2376_v35 }
 0xa78   : > { %2359 = vmatpush.msrb.mxu0 %v2334_v0  ;;  %v3182_v0 = vld [vmem:[%s4236_s21] ss:$0 sm:$0xff] }
 0xa79   : > { %2400 = vmatpush.msrb.mxu1 %v2375_v29 }
 0xa7a   : > { %2360 = vmatpush.msrb.mxu0 %v2333_v3 }
 0xa7b   : > { %2401 = vmatpush.msrb.mxu1 %v2374_v46 }
 0xa7c   : > { %2361 = vmatpush.msrb.mxu0 %v2332_v4 }
 0xa7e   : > { %2362 = vmatpush.msrb.mxu0 %v2331_v6 }
 0xa80   : > { %2363 = vmatpush.msrb.mxu0 %v2330_v8 }
 0xa82   : > { %2364 = vmatpush.msrb.mxu0 %v2329_v10 }
 0xadf   : > { %v2167_v50 = vpop.f32.mrf.mxu0 }
 0xae0   : > { %v2168_v51 = vadd.f32 %v3180_v49, %v2167_v50  ;;  %v2373_v49 = vld [vmem:[#allocation14 + $0x18] sm:$0xff] }
 0xae1   : > { %2402 = vmatpush.msrb.mxu1 %v2373_v49 }
 0xae2   : > { %3183 = vtanh.f32 %v2168_v51 }
 0xae3   : > { %2403 = vmatpush.msrb.mxu1 %v2372_v58 }
 0xae5   : > { %2404 = vmatpush.msrb.mxu1 %v2371_v60 }
 0xae7   : > { %2405 = vmatpush.msrb.mxu1 %v2370_v44 }
 0xae8   : > { %v3184_v52 = vpop.eup %3183 }
 0xae9   : > { %2243 = vmatmul.f32.vlgmr.msra.gmra.mxu1 %v3184_v52  ;;  %2263 = vmatmul.f32.vlgmr.msra.gmra.mxu2 %v3184_v52 }
 0xaea   : > { %2283 = vmatmul.f32.vlgmr.msra.gmra.mxu3 %v3184_v52 }
 0xb66   : > { %v2244_v1 = vpop.f32.mrf.mxu1 }
 0xb67   : > { %v2245_v2 = vadd.f32 %v2244_v1, %v2221_v62 }
 0xb69   : > { %v2935_v5 = vmul.f32 -1.442695, %v2245_v2 }
 0xb6b   : > { %3185 = vpow2.f32 %v2935_v5 }
 0xb6c   : > { %v2264_v43 = vpop.f32.mrf.mxu2 }
 0xb6d   : > { %v2284_v9 = vpop.f32.mrf.mxu3  ;;  %v2265_v24 = vadd.f32 %v2264_v43, %v2222_v18 }
 0xb6e   : > { %v2285_v11 = vadd.f32 %v2284_v9, %v2223_v7 }
 0xb70   : > { %v2936_v12 = vmul.f32 -1.442695, %v2285_v11 }
 0xb71   : > { %v3186_v15 = vpop.eup %3185 }
 0xb72   : > { %v2290_v16 = vadd.f32 1.0, %v3186_v15  ;;  %3187 = vpow2.f32 %v2936_v12 }
 0xb74   : > { %3189 = vrcp.f32 %v2290_v16  ;;  %v2302_v31 = vand.u32 2147483648, %v2290_v16  ;;  %v2300_v34 = vand.u32 2147483647, %v2290_v16  ;;  %vm2296_vm8 = vweird.f32 %v2290_v16 }
 0xb76   : > { %v2303_v37 = vor.u32 1.1754944e-38, %v2302_v31  ;;  %vm2301_vm10 = vcmp.eq.f32.partialorder %v2300_v34, 8.507059e+37 }
 0xb78   : > { %v3188_v20 = vpop.eup %3187 }
 0xb79   : > { %v2310_v22 = vadd.f32 1.0, %v3188_v20 }
 0xb7a   : > { %v3190_v23 = vpop.eup %3189 }
 0xb7b   : > { %v2292_v26 = vmul.f32 %v3190_v23, %v2290_v16  ;;  %3191 = vrcp.f32 %v2310_v22  ;;  %vm2297_vm7 = vweird.f32 %v3190_v23  ;;  %v2322_v50 = vand.u32 2147483648, %v2310_v22 }
 0xb7c   : > { %3193 = vtanh.f32 %v2265_v24  ;;  %vm2298_vm9 = vmor %vm2296_vm8, %vm2297_vm7  ;;  %vm2316_vm12 = vweird.f32 %v2310_v22  ;;  %v2320_v52 = vand.u32 2147483647, %v2310_v22 }
 0xb7d   : > { %v2293_v30 = vsub.f32 1.0, %v2292_v26  ;;  %v2323_v54 = vor.u32 1.1754944e-38, %v2322_v50 }
 0xb7e   : > { %vm2321_vm14 = vcmp.eq.f32.partialorder %v2320_v52, 8.507059e+37 }
 0xb7f   : > { %v2294_v38 = vmul.f32 %v3190_v23, %v2293_v30 }
 0xb81   : > { %v3192_v36 = vpop.eup %3191  ;;  %v2295_v32 = vadd.f32 %v3190_v23, %v2294_v38 }
 0xb82   : > { %v2312_v28 = vmul.f32 %v3192_v36, %v2310_v22  ;;  %v3194_v42 = vpop.eup %3193  ;;  %vm2317_vm11 = vweird.f32 %v3192_v36 }
 0xb83   : > { %v2299_v41 = vsel %vm2298_vm9, %v3190_v23, %v2295_v32  ;;  %vm2318_vm13 = vmor %vm2316_vm12, %vm2317_vm11 }
 0xb84   : > { %v2304_v45 = vsel %vm2301_vm10, %v2303_v37, %v2299_v41  ;;  %v2313_v39 = vsub.f32 1.0, %v2312_v28 }
 0xb85   : > { %v2326_v47 = vmul.f32 %v3194_v42, %v2304_v45 }
 0xb86   : > { %v2314_v48 = vmul.f32 %v3192_v36, %v2313_v39 }
 0xb87   : > { %3195 = vtanh.f32 %v2326_v47 }
 0xb88   : > { %v2315_v51 = vadd.f32 %v3192_v36, %v2314_v48 }
 0xb8a   : > { %v2319_v53 = vsel %vm2318_vm13, %v3192_v36, %v2315_v51 }
 0xb8b   : > { %v2324_v57 = vsel %vm2321_vm14, %v2323_v54, %v2319_v53 }
 0xb8d   : > { %v3196_v55 = vpop.eup %3195 }
 0xb8e   : > { %v2328_v40 = vmul.f32 %v3196_v55, %v2324_v57 }
 0xb90   : > { %2365 = vmatmul.f32.vlgmr.msrb.gmra.mxu0 %v2328_v40 }
 0xc0d   : > { %v2366_v56 = vpop.f32.mrf.mxu0 }
 0xc0e   : > { %v2367_v62 = vadd.f32 %v3181_v61, %v2366_v56 }
 0xc10   : > { %v2369_v63 = vmax.f32 %v2367_v62, 0.0 }
 0xc12   : > { %2406 = vmatmul.f32.vlgmr.msrb.gmra.mxu1 %v2369_v63 }
 0xc8f   : > { %v2407_v1 = vpop.f32.mrf.mxu1 }
 0xc90   : > { %v2408_v2 = vadd.f32 %v3182_v0, %v2407_v1 }
 0xc92   : > { %2410 = vst [vmem:[#allocation15] sm:$0x3] %v2408_v2 }
 0xc93 PF: > { %p3070_p4 = scmp.eq.s32.totalorder %s3647_s6, 1  ;;  %s3502_s2 = smov [#allocation15]  }
 0xc94   : > { %s2417_s16 = sshll.u32 %s3502_s2, 4  ;;  %s4237_s4 = sld [smem:[#allocation45_spill]]  ;;  %s2418_s16 = int_to_ptr.vmem [resolvable:$true] %s2417_s16 }
 0xc9a   : > { %s2419_s29 = sshll.u32 %s4237_s4, 4  ;;  %s2420_s29 = int_to_ptr.hbm [resolvable:$true] %s2419_s29 }
 0xc9b   : > { %3035 = dma.vmem_to_hbm [thread:$0]  (%p3070_p4), %s2418_s16, 32, %s2420_s29, [#allocation5]  }
 0xc9c   : > { %3468 = dma.done.wait (%p3070_p4), [#allocation5], 32  }
 0xc9d   : > { %3470 = vsyncadd (%p3070_p4), [#allocation5], 4294967264 }
 0xc9e PF: > { %s4238_s28 = sld [smem:[#allocation22_spill]]  ;;  %s4241_s5 = smov %s3477_s26 }
 0xc9f   : > { %s4239_s14 = sld [smem:[#allocation21_spill]] }
 0xca0   : > { %s4240_s27 = sld [smem:[#allocation23_spill]] }
 0xca4   : > { %p40_p5 = scmp.ge.s32.totalorder %s4238_s28, 4  }
 0xca5   : > { %s4242_s26 = smov %s4239_s14 }
 0xca6   :  { %42 = sbr.rel (!%p40_p5) target bundleno = 31 (0x1f), region = 228 }
 0xcab   :  { %2433 = vsyncpa [#allocation4], 1 }
 0xcac   :  { %2435 = vsyncpa [#allocation4 + $0x1], 1 }
 0xcad   :  { %2436 = vsyncpa [#allocation7], 1 }
 0xcae   :  { %2438 = vsyncpa [#allocation7 + $0x1], 1 }
 0xcaf   :  { %2439 = vsyncpa [#allocation10], 1 }
 0xcb0   :  { %2440 = vsyncpa [#allocation13], 1 }
 0xcb1   :  { %2441 = vsyncpa [#allocation5], 1 }
 0xcb2   :  { %2443 = vsyncpa [#allocation5 + $0x1], 1 }

</bundles_post_ra>
